<compile_context>
chip_gen: v7x
topology: tpu7x:2x2x1
jax: 0.10.0
libtpu: 0.0.40
codegen_flags: <defaults>
</compile_context>

<pallas_src>
import jax
import jax.numpy as jnp
from jax import lax
from jax.experimental import pallas as pl
from jax.experimental.pallas import tpu as pltpu


def _is_pow2(n):
    return n > 0 and (n & (n - 1)) == 0


def _plan_layer(d_in, d_out):
    """Static per-layer compute strategy."""
    L = d_in * d_out
    if d_out % 128 == 0:
        # Every per-d lane slice of the flat weight block is 128-lane aligned,
        # so the simple FMA loop has no XLU rotate cost.
        return "loop"
    if 4 * d_in * L > (2 << 20):
        # 0/1 replication matrix too large to build cheaply each grid step.
        # TODO(synk): group-aligned-slab path for large layers with unaligned d_out.
        return "loop"
    if _is_pow2(d_in) and _is_pow2(d_out) and d_out <= 128:
        return "mxu_roll"
    return "mxu_mxu"


def _layer(h, w_ref, d_in, d_out, plan):
    """One hyper-layer: out[b, o] = bias[b, o] + sum_d h[b, d] * W[b, d, o]."""
    L = d_in * d_out
    bias = w_ref[:, L:L + d_out].astype(jnp.float32)

    if plan == "loop":
        acc = bias
        for d in range(d_in):
            w_row = w_ref[:, d * d_out:(d + 1) * d_out].astype(jnp.float32)
            acc = acc + h[:, d:d + 1] * w_row
        return acc

    # --- MXU replicate: h_rep[b, d*d_out + o] = h[b, d] via 0/1 matrix E.
    # E is exact in bf16 (0/1), and precision=HIGHEST keeps h un-truncated, so
    # the replication is bit-faithful even though the MXU is bf16-native.
    r = lax.broadcasted_iota(jnp.int32, (d_in, L), 0)
    c = lax.broadcasted_iota(jnp.int32, (d_in, L), 1)
    lo = r * d_out
    rep = ((c >= lo) & (c < lo + d_out)).astype(jnp.float32)
    h_rep = jnp.dot(h, rep, precision=lax.Precision.HIGHEST,
                    preferred_element_type=jnp.float32)
    prod = h_rep * w_ref[:, :L].astype(jnp.float32)      # lane-aligned whole block

    if plan == "mxu_roll":
        # Segmented lane reduction:
        #  1) fold 128-lane-aligned slabs (free slices + VPU adds),
        #  2) log2 roll tree over the 128//d_out segments (few XLU rotates).
        width = min(L, 128)
        acc = prod[:, :width]
        for v in range(1, L // width):
            acc = acc + prod[:, v * width:(v + 1) * width]
        s = width // 2
        while s >= d_out:
            acc = acc + pltpu.roll(acc, s, axis=1)
            s //= 2
        return bias + acc[:, :d_out]

    # plan == "mxu_mxu": general d_out, reduce with a second 0/1 MXU matmul.
    rr = lax.broadcasted_iota(jnp.int32, (L, d_out), 0)
    cc = lax.broadcasted_iota(jnp.int32, (L, d_out), 1)
    red = ((rr % d_out) == cc).astype(jnp.float32)
    return bias + jnp.dot(prod, red, precision=lax.Precision.HIGHEST,
                          preferred_element_type=jnp.float32)


def _make_kernel(layer_dims, plans):
    num_layers = len(layer_dims)

    def kernel(x_ref, *refs):
        w_refs = refs[:num_layers]
        o_ref = refs[num_layers]
        h = x_ref[...].astype(jnp.float32)
        for li, (d_in, d_out) in enumerate(layer_dims):
            acc = _layer(h, w_refs[li], d_in, d_out, plans[li])
            h = acc * jax.nn.sigmoid(acc) if li + 1 < num_layers else acc
        o_ref[...] = h.astype(o_ref.dtype)

    return kernel


def pose_regressor_hyper(x, weights, decoder_dim, hidden_dim, output_dim,
                         hidden_scale=1.0, max_tile=256):
    """Pallas implementation of PoseRegressorHyper.forward.

    x:       (B, decoder_dim)
    weights: dict 'w_h1'..'w_h{n}', 'w_o' — flat per-sample matrices
             (B, (d_in+1)*d_out); f32 or bf16.
    """
    b = x.shape[0]
    num_hidden = len(weights) - 1
    hdim_s = int(hidden_dim * hidden_scale)
    if num_hidden >= 3:
        assert hdim_s == hidden_dim, "hidden_scale incompatible with >2 hidden layers"

    layer_dims = [(decoder_dim, hidden_dim)]
    layer_dims += [(hidden_dim, hdim_s)] * (num_hidden - 1)
    layer_dims += [(hdim_s, output_dim)]

    w_list = [weights['w_h1']]
    for i in range(num_hidden - 1):
        w_list.append(weights[f'w_h{i + 2}'])
    w_list.append(weights['w_o'])
    for w, (d_in, d_out) in zip(w_list, layer_dims):
        assert w.shape == (b, (d_in + 1) * d_out), (w.shape, (b, (d_in + 1) * d_out))

    plans = tuple(_plan_layer(d_in, d_out) for d_in, d_out in layer_dims)

    # --- batch tile: dtype-aware, large, multiple of 8, double-buffered inputs
    # under a 12 MiB budget; >=2 grid steps when feasible (v7x dual-TC sharding).
    per_sample_bytes = (x.dtype.itemsize * (decoder_dim + output_dim)
                        + sum(w.dtype.itemsize * w.shape[1] for w in w_list))
    vmem_budget = 12 * 1024 * 1024
    tb = min(max_tile, max(8, vmem_budget // (2 * per_sample_bytes)))
    tb = max(8, (tb // 8) * 8)
    tb = min(tb, ((b + 7) // 8) * 8)                 # no bigger than (rounded) batch
    if b >= 16:                                       # keep >= 2 grid steps
        tb = min(tb, (((b + 1) // 2) + 7) // 8 * 8)

    grid = (pl.cdiv(b, tb),)                          # ragged last block is masked

    in_specs = [pl.BlockSpec((tb, decoder_dim), lambda i: (i, 0))]
    for w in w_list:
        in_specs.append(pl.BlockSpec((tb, w.shape[1]), lambda i: (i, 0)))
    out_specs = pl.BlockSpec((tb, output_dim), lambda i: (i, 0))

    total_params = sum((di + 1) * do for di, do in layer_dims)
    bytes_accessed = int(x.dtype.itemsize * b * (decoder_dim + output_dim)
                         + sum(w.dtype.itemsize * w.size for w in w_list))
    cost = pl.CostEstimate(
        flops=int(2 * b * total_params),
        transcendentals=int(b * sum(do for _, do in layer_dims[:-1])),
        bytes_accessed=bytes_accessed,
    )

    vmem_limit = int(max(24 * 1024 * 1024,
                         2 * tb * per_sample_bytes + 8 * 1024 * 1024))

    out = pl.pallas_call(
        _make_kernel(tuple(layer_dims), plans),
        out_shape=jax.ShapeDtypeStruct((b, output_dim), x.dtype),
        grid=grid,
        in_specs=in_specs,
        out_specs=out_specs,
        compiler_params=pltpu.CompilerParams(
            dimension_semantics=("parallel",),
            vmem_limit_bytes=vmem_limit),
        cost_estimate=cost,
    )(x, *w_list)
    return out


def reference(x, weights, decoder_dim, hidden_dim, output_dim, hidden_scale=1.0):
    """Pure-JAX port of the PyTorch forward, for verification."""
    def blin(h, wb):
        one = jnp.ones(h.shape[:-1] + (1,), h.dtype)
        return jnp.einsum('bd,bdh->bh', jnp.concatenate([h, one], axis=-1), wb)

    def swish(v):
        return v * jax.nn.sigmoid(v)

    b = x.shape[0]
    hdim_s = int(hidden_dim * hidden_scale)
    h = swish(blin(x, weights['w_h1'].reshape(b, decoder_dim + 1, hidden_dim)))
    for i in range(len(weights) - 2):
        h = swish(blin(h, weights[f'w_h{i + 2}'].reshape(b, hidden_dim + 1, hdim_s)))
    return blin(h, weights['w_o'].reshape(b, hdim_s + 1, output_dim))


if __name__ == "__main__":
    # Keep the pure-JAX reference einsum in true f32 (kernel dots are already
    # explicitly precision=HIGHEST).
    jax.config.update("jax_default_matmul_precision", "highest")

    D, H, O = 32, 32, 4            # decoder_dim, hidden_dim, output_dim
    NUM_HIDDEN = 3                 # weights: w_h1, w_h2, w_h3, w_o

    def make_inputs(key, b):
        keys = jax.random.split(key, NUM_HIDDEN + 2)
        x = jax.random.normal(keys[0], (b, D), jnp.float32)
        w = {'w_h1': 0.1 * jax.random.normal(keys[1], (b, (D + 1) * H), jnp.float32)}
        for i in range(NUM_HIDDEN - 1):
            w[f'w_h{i + 2}'] = 0.1 * jax.random.normal(
                keys[2 + i], (b, (H + 1) * H), jnp.float32)
        w['w_o'] = 0.1 * jax.random.normal(
            keys[NUM_HIDDEN + 1], (b, (H + 1) * O), jnp.float32)
        return x, w

    # config 1: tiny batch -> single (ragged) block, no host-side padding
    B = 2
    x1, w1 = make_inputs(jax.random.PRNGKey(0), B)
    out1 = jax.block_until_ready(pose_regressor_hyper(x1, w1, D, H, O))
    ref1 = reference(x1, w1, D, H, O)
    assert out1.shape == (B, O), out1.shape
    assert jnp.allclose(out1, ref1, atol=1e-4, rtol=1e-4), (out1, ref1)

    # config 2: non-multiple-of-8 batch -> 2 grid steps + masked ragged tail
    B2 = 20
    x2, w2 = make_inputs(jax.random.PRNGKey(1), B2)
    out2 = jax.block_until_ready(pose_regressor_hyper(x2, w2, D, H, O))
    ref2 = reference(x2, w2, D, H, O)
    assert out2.shape == (B2, O), out2.shape
    assert jnp.allclose(out2, ref2, atol=1e-4, rtol=1e-4), (out2, ref2)

    # config 3: bf16 hyper-weights at the pallas_call boundary (halves HBM bytes)
    w2_bf16 = {k: v.astype(jnp.bfloat16) for k, v in w2.items()}
    out3 = jax.block_until_ready(pose_regressor_hyper(x2, w2_bf16, D, H, O))
    ref3 = reference(x2, {k: v.astype(jnp.float32) for k, v in w2_bf16.items()},
                     D, H, O)
    assert out3.shape == (B2, O), out3.shape
    assert jnp.allclose(out3, ref3, atol=1e-3, rtol=1e-3), (out3, ref3)

    print("KERNEL_OK")
</pallas_src>

<mosaic_0001>
module attributes {stable_mosaic.version = 11 : i64} {
  func.func @kernel(%arg0: i32, %arg1: memref<8x32xf32, #tpu.memory_space<vmem>>, %arg2: memref<8x1056xf32, #tpu.memory_space<vmem>>, %arg3: memref<8x1056xf32, #tpu.memory_space<vmem>>, %arg4: memref<8x1056xf32, #tpu.memory_space<vmem>>, %arg5: memref<8x132xf32, #tpu.memory_space<vmem>>, %arg6: memref<8x4xf32, #tpu.memory_space<vmem>>) attributes {dimension_semantics = [#tpu.dimension_semantics<parallel>], iteration_bounds = array<i64: 1>, scalar_prefetch = 0 : i64, scratch_operands = 0 : i64, tpu.core_type = #tpu.core_type<tc>, window_params = [{transform_indices = @transform_0, window_bounds = array<i64: 8, 32>}, {transform_indices = @transform_1, window_bounds = array<i64: 8, 1056>}, {transform_indices = @transform_2, window_bounds = array<i64: 8, 1056>}, {transform_indices = @transform_3, window_bounds = array<i64: 8, 1056>}, {transform_indices = @transform_4, window_bounds = array<i64: 8, 132>}, {transform_indices = @transform_5, window_bounds = array<i64: 8, 4>}]} {
    %c0 = arith.constant 0 : index
    %c0_0 = arith.constant 0 : index
    %0 = vector.load %arg1[%c0, %c0_0] : memref<8x32xf32, #tpu.memory_space<vmem>>, vector<8x32xf32>
    %c0_1 = arith.constant 0 : index
    %c1024 = arith.constant 1024 : index
    %1 = vector.load %arg2[%c0_1, %c1024] : memref<8x1056xf32, #tpu.memory_space<vmem>>, vector<8x32xf32>
    %2 = tpu.iota {dimensions = array<i32: 0>} : vector<32x1024xi32>
    %3 = tpu.iota {dimensions = array<i32: 1>} : vector<32x1024xi32>
    %c32_i32 = arith.constant 32 : i32
    %4 = vector.broadcast %c32_i32 : i32 to vector<32x1024xi32>
    %5 = arith.muli %2, %4 : vector<32x1024xi32>
    %6 = arith.cmpi sge, %3, %5 : vector<32x1024xi32>
    %c32_i32_2 = arith.constant 32 : i32
    %7 = vector.broadcast %c32_i32_2 : i32 to vector<32x1024xi32>
    %8 = arith.addi %5, %7 : vector<32x1024xi32>
    %9 = arith.cmpi slt, %3, %8 : vector<32x1024xi32>
    %10 = arith.andi %6, %9 : vector<32x1024xi1>
    %11 = arith.extui %10 : vector<32x1024xi1> to vector<32x1024xi32>
    %12 = arith.sitofp %11 : vector<32x1024xi32> to vector<32x1024xf32>
    %cst = arith.constant dense<0.000000e+00> : vector<8x1024xf32>
    %13 = tpu.matmul %0, %12, %cst {dimension_numbers = #tpu.dot_dimension_numbers<[1], [0], [0], [1], [0, 0, 1, 1], [], []>, precision = #tpu.contract_precision<fp32>} : vector<8x32xf32>, vector<32x1024xf32>, vector<8x1024xf32> -> vector<8x1024xf32>
    %c0_3 = arith.constant 0 : index
    %c0_4 = arith.constant 0 : index
    %14 = vector.load %arg2[%c0_3, %c0_4] : memref<8x1056xf32, #tpu.memory_space<vmem>>, vector<8x1024xf32>
    %15 = arith.mulf %13, %14 : vector<8x1024xf32>
    %16 = vector.extract_strided_slice %15 {offsets = [0, 0], sizes = [8, 128], strides = [1, 1]} : vector<8x1024xf32> to vector<8x128xf32>
    %17 = vector.extract_strided_slice %15 {offsets = [0, 128], sizes = [8, 128], strides = [1, 1]} : vector<8x1024xf32> to vector<8x128xf32>
    %18 = arith.addf %16, %17 : vector<8x128xf32>
    %19 = vector.extract_strided_slice %15 {offsets = [0, 256], sizes = [8, 128], strides = [1, 1]} : vector<8x1024xf32> to vector<8x128xf32>
    %20 = arith.addf %18, %19 : vector<8x128xf32>
    %21 = vector.extract_strided_slice %15 {offsets = [0, 384], sizes = [8, 128], strides = [1, 1]} : vector<8x1024xf32> to vector<8x128xf32>
    %22 = arith.addf %20, %21 : vector<8x128xf32>
    %23 = vector.extract_strided_slice %15 {offsets = [0, 512], sizes = [8, 128], strides = [1, 1]} : vector<8x1024xf32> to vector<8x128xf32>
    %24 = arith.addf %22, %23 : vector<8x128xf32>
    %25 = vector.extract_strided_slice %15 {offsets = [0, 640], sizes = [8, 128], strides = [1, 1]} : vector<8x1024xf32> to vector<8x128xf32>
    %26 = arith.addf %24, %25 : vector<8x128xf32>
    %27 = vector.extract_strided_slice %15 {offsets = [0, 768], sizes = [8, 128], strides = [1, 1]} : vector<8x1024xf32> to vector<8x128xf32>
    %28 = arith.addf %26, %27 : vector<8x128xf32>
    %29 = vector.extract_strided_slice %15 {offsets = [0, 896], sizes = [8, 128], strides = [1, 1]} : vector<8x1024xf32> to vector<8x128xf32>
    %30 = arith.addf %28, %29 : vector<8x128xf32>
    %c64_i32 = arith.constant 64 : i32
    %31 = tpu.dynamic_rotate %30 by %c64_i32 dim 1 : vector<8x128xf32>, i32 -> vector<8x128xf32>
    %32 = arith.addf %30, %31 : vector<8x128xf32>
    %c32_i32_5 = arith.constant 32 : i32
    %33 = tpu.dynamic_rotate %32 by %c32_i32_5 dim 1 : vector<8x128xf32>, i32 -> vector<8x128xf32>
    %34 = arith.addf %32, %33 : vector<8x128xf32>
    %35 = vector.extract_strided_slice %34 {offsets = [0, 0], sizes = [8, 32], strides = [1, 1]} : vector<8x128xf32> to vector<8x32xf32>
    %36 = arith.addf %1, %35 : vector<8x32xf32>
    %37 = arith.negf %36 : vector<8x32xf32>
    %38 = math.exp %37 : vector<8x32xf32>
    %cst_6 = arith.constant 1.000000e+00 : f32
    %39 = vector.broadcast %cst_6 : f32 to vector<8x32xf32>
    %40 = arith.addf %39, %38 : vector<8x32xf32>
    %41 = arith.divf %39, %40 : vector<8x32xf32>
    %42 = arith.mulf %36, %41 : vector<8x32xf32>
    %c0_7 = arith.constant 0 : index
    %c1024_8 = arith.constant 1024 : index
    %43 = vector.load %arg3[%c0_7, %c1024_8] : memref<8x1056xf32, #tpu.memory_space<vmem>>, vector<8x32xf32>
    %44 = tpu.iota {dimensions = array<i32: 0>} : vector<32x1024xi32>
    %45 = tpu.iota {dimensions = array<i32: 1>} : vector<32x1024xi32>
    %c32_i32_9 = arith.constant 32 : i32
    %46 = vector.broadcast %c32_i32_9 : i32 to vector<32x1024xi32>
    %47 = arith.muli %44, %46 : vector<32x1024xi32>
    %48 = arith.cmpi sge, %45, %47 : vector<32x1024xi32>
    %c32_i32_10 = arith.constant 32 : i32
    %49 = vector.broadcast %c32_i32_10 : i32 to vector<32x1024xi32>
    %50 = arith.addi %47, %49 : vector<32x1024xi32>
    %51 = arith.cmpi slt, %45, %50 : vector<32x1024xi32>
    %52 = arith.andi %48, %51 : vector<32x1024xi1>
    %53 = arith.extui %52 : vector<32x1024xi1> to vector<32x1024xi32>
    %54 = arith.sitofp %53 : vector<32x1024xi32> to vector<32x1024xf32>
    %cst_11 = arith.constant dense<0.000000e+00> : vector<8x1024xf32>
    %55 = tpu.matmul %42, %54, %cst_11 {dimension_numbers = #tpu.dot_dimension_numbers<[1], [0], [0], [1], [0, 0, 1, 1], [], []>, precision = #tpu.contract_precision<fp32>} : vector<8x32xf32>, vector<32x1024xf32>, vector<8x1024xf32> -> vector<8x1024xf32>
    %c0_12 = arith.constant 0 : index
    %c0_13 = arith.constant 0 : index
    %56 = vector.load %arg3[%c0_12, %c0_13] : memref<8x1056xf32, #tpu.memory_space<vmem>>, vector<8x1024xf32>
    %57 = arith.mulf %55, %56 : vector<8x1024xf32>
    %58 = vector.extract_strided_slice %57 {offsets = [0, 0], sizes = [8, 128], strides = [1, 1]} : vector<8x1024xf32> to vector<8x128xf32>
    %59 = vector.extract_strided_slice %57 {offsets = [0, 128], sizes = [8, 128], strides = [1, 1]} : vector<8x1024xf32> to vector<8x128xf32>
    %60 = arith.addf %58, %59 : vector<8x128xf32>
    %61 = vector.extract_strided_slice %57 {offsets = [0, 256], sizes = [8, 128], strides = [1, 1]} : vector<8x1024xf32> to vector<8x128xf32>
    %62 = arith.addf %60, %61 : vector<8x128xf32>
    %63 = vector.extract_strided_slice %57 {offsets = [0, 384], sizes = [8, 128], strides = [1, 1]} : vector<8x1024xf32> to vector<8x128xf32>
    %64 = arith.addf %62, %63 : vector<8x128xf32>
    %65 = vector.extract_strided_slice %57 {offsets = [0, 512], sizes = [8, 128], strides = [1, 1]} : vector<8x1024xf32> to vector<8x128xf32>
    %66 = arith.addf %64, %65 : vector<8x128xf32>
    %67 = vector.extract_strided_slice %57 {offsets = [0, 640], sizes = [8, 128], strides = [1, 1]} : vector<8x1024xf32> to vector<8x128xf32>
    %68 = arith.addf %66, %67 : vector<8x128xf32>
    %69 = vector.extract_strided_slice %57 {offsets = [0, 768], sizes = [8, 128], strides = [1, 1]} : vector<8x1024xf32> to vector<8x128xf32>
    %70 = arith.addf %68, %69 : vector<8x128xf32>
    %71 = vector.extract_strided_slice %57 {offsets = [0, 896], sizes = [8, 128], strides = [1, 1]} : vector<8x1024xf32> to vector<8x128xf32>
    %72 = arith.addf %70, %71 : vector<8x128xf32>
    %c64_i32_14 = arith.constant 64 : i32
    %73 = tpu.dynamic_rotate %72 by %c64_i32_14 dim 1 : vector<8x128xf32>, i32 -> vector<8x128xf32>
    %74 = arith.addf %72, %73 : vector<8x128xf32>
    %c32_i32_15 = arith.constant 32 : i32
    %75 = tpu.dynamic_rotate %74 by %c32_i32_15 dim 1 : vector<8x128xf32>, i32 -> vector<8x128xf32>
    %76 = arith.addf %74, %75 : vector<8x128xf32>
    %77 = vector.extract_strided_slice %76 {offsets = [0, 0], sizes = [8, 32], strides = [1, 1]} : vector<8x128xf32> to vector<8x32xf32>
    %78 = arith.addf %43, %77 : vector<8x32xf32>
    %79 = arith.negf %78 : vector<8x32xf32>
    %80 = math.exp %79 : vector<8x32xf32>
    %cst_16 = arith.constant 1.000000e+00 : f32
    %81 = vector.broadcast %cst_16 : f32 to vector<8x32xf32>
    %82 = arith.addf %81, %80 : vector<8x32xf32>
    %83 = arith.divf %81, %82 : vector<8x32xf32>
    %84 = arith.mulf %78, %83 : vector<8x32xf32>
    %c0_17 = arith.constant 0 : index
    %c1024_18 = arith.constant 1024 : index
    %85 = vector.load %arg4[%c0_17, %c1024_18] : memref<8x1056xf32, #tpu.memory_space<vmem>>, vector<8x32xf32>
    %86 = tpu.iota {dimensions = array<i32: 0>} : vector<32x1024xi32>
    %87 = tpu.iota {dimensions = array<i32: 1>} : vector<32x1024xi32>
    %c32_i32_19 = arith.constant 32 : i32
    %88 = vector.broadcast %c32_i32_19 : i32 to vector<32x1024xi32>
    %89 = arith.muli %86, %88 : vector<32x1024xi32>
    %90 = arith.cmpi sge, %87, %89 : vector<32x1024xi32>
    %c32_i32_20 = arith.constant 32 : i32
    %91 = vector.broadcast %c32_i32_20 : i32 to vector<32x1024xi32>
    %92 = arith.addi %89, %91 : vector<32x1024xi32>
    %93 = arith.cmpi slt, %87, %92 : vector<32x1024xi32>
    %94 = arith.andi %90, %93 : vector<32x1024xi1>
    %95 = arith.extui %94 : vector<32x1024xi1> to vector<32x1024xi32>
    %96 = arith.sitofp %95 : vector<32x1024xi32> to vector<32x1024xf32>
    %cst_21 = arith.constant dense<0.000000e+00> : vector<8x1024xf32>
    %97 = tpu.matmul %84, %96, %cst_21 {dimension_numbers = #tpu.dot_dimension_numbers<[1], [0], [0], [1], [0, 0, 1, 1], [], []>, precision = #tpu.contract_precision<fp32>} : vector<8x32xf32>, vector<32x1024xf32>, vector<8x1024xf32> -> vector<8x1024xf32>
    %c0_22 = arith.constant 0 : index
    %c0_23 = arith.constant 0 : index
    %98 = vector.load %arg4[%c0_22, %c0_23] : memref<8x1056xf32, #tpu.memory_space<vmem>>, vector<8x1024xf32>
    %99 = arith.mulf %97, %98 : vector<8x1024xf32>
    %100 = vector.extract_strided_slice %99 {offsets = [0, 0], sizes = [8, 128], strides = [1, 1]} : vector<8x1024xf32> to vector<8x128xf32>
    %101 = vector.extract_strided_slice %99 {offsets = [0, 128], sizes = [8, 128], strides = [1, 1]} : vector<8x1024xf32> to vector<8x128xf32>
    %102 = arith.addf %100, %101 : vector<8x128xf32>
    %103 = vector.extract_strided_slice %99 {offsets = [0, 256], sizes = [8, 128], strides = [1, 1]} : vector<8x1024xf32> to vector<8x128xf32>
    %104 = arith.addf %102, %103 : vector<8x128xf32>
    %105 = vector.extract_strided_slice %99 {offsets = [0, 384], sizes = [8, 128], strides = [1, 1]} : vector<8x1024xf32> to vector<8x128xf32>
    %106 = arith.addf %104, %105 : vector<8x128xf32>
    %107 = vector.extract_strided_slice %99 {offsets = [0, 512], sizes = [8, 128], strides = [1, 1]} : vector<8x1024xf32> to vector<8x128xf32>
    %108 = arith.addf %106, %107 : vector<8x128xf32>
    %109 = vector.extract_strided_slice %99 {offsets = [0, 640], sizes = [8, 128], strides = [1, 1]} : vector<8x1024xf32> to vector<8x128xf32>
    %110 = arith.addf %108, %109 : vector<8x128xf32>
    %111 = vector.extract_strided_slice %99 {offsets = [0, 768], sizes = [8, 128], strides = [1, 1]} : vector<8x1024xf32> to vector<8x128xf32>
    %112 = arith.addf %110, %111 : vector<8x128xf32>
    %113 = vector.extract_strided_slice %99 {offsets = [0, 896], sizes = [8, 128], strides = [1, 1]} : vector<8x1024xf32> to vector<8x128xf32>
    %114 = arith.addf %112, %113 : vector<8x128xf32>
    %c64_i32_24 = arith.constant 64 : i32
    %115 = tpu.dynamic_rotate %114 by %c64_i32_24 dim 1 : vector<8x128xf32>, i32 -> vector<8x128xf32>
    %116 = arith.addf %114, %115 : vector<8x128xf32>
    %c32_i32_25 = arith.constant 32 : i32
    %117 = tpu.dynamic_rotate %116 by %c32_i32_25 dim 1 : vector<8x128xf32>, i32 -> vector<8x128xf32>
    %118 = arith.addf %116, %117 : vector<8x128xf32>
    %119 = vector.extract_strided_slice %118 {offsets = [0, 0], sizes = [8, 32], strides = [1, 1]} : vector<8x128xf32> to vector<8x32xf32>
    %120 = arith.addf %85, %119 : vector<8x32xf32>
    %121 = arith.negf %120 : vector<8x32xf32>
    %122 = math.exp %121 : vector<8x32xf32>
    %cst_26 = arith.constant 1.000000e+00 : f32
    %123 = vector.broadcast %cst_26 : f32 to vector<8x32xf32>
    %124 = arith.addf %123, %122 : vector<8x32xf32>
    %125 = arith.divf %123, %124 : vector<8x32xf32>
    %126 = arith.mulf %120, %125 : vector<8x32xf32>
    %c0_27 = arith.constant 0 : index
    %c128 = arith.constant 128 : index
    %127 = vector.load %arg5[%c0_27, %c128] : memref<8x132xf32, #tpu.memory_space<vmem>>, vector<8x4xf32>
    %128 = tpu.iota {dimensions = array<i32: 0>} : vector<32x128xi32>
    %129 = tpu.iota {dimensions = array<i32: 1>} : vector<32x128xi32>
    %c4_i32 = arith.constant 4 : i32
    %130 = vector.broadcast %c4_i32 : i32 to vector<32x128xi32>
    %131 = arith.muli %128, %130 : vector<32x128xi32>
    %132 = arith.cmpi sge, %129, %131 : vector<32x128xi32>
    %c4_i32_28 = arith.constant 4 : i32
    %133 = vector.broadcast %c4_i32_28 : i32 to vector<32x128xi32>
    %134 = arith.addi %131, %133 : vector<32x128xi32>
    %135 = arith.cmpi slt, %129, %134 : vector<32x128xi32>
    %136 = arith.andi %132, %135 : vector<32x128xi1>
    %137 = arith.extui %136 : vector<32x128xi1> to vector<32x128xi32>
    %138 = arith.sitofp %137 : vector<32x128xi32> to vector<32x128xf32>
    %cst_29 = arith.constant dense<0.000000e+00> : vector<8x128xf32>
    %139 = tpu.matmul %126, %138, %cst_29 {dimension_numbers = #tpu.dot_dimension_numbers<[1], [0], [0], [1], [0, 0, 1, 1], [], []>, precision = #tpu.contract_precision<fp32>} : vector<8x32xf32>, vector<32x128xf32>, vector<8x128xf32> -> vector<8x128xf32>
    %c0_30 = arith.constant 0 : index
    %c0_31 = arith.constant 0 : index
    %140 = vector.load %arg5[%c0_30, %c0_31] : memref<8x132xf32, #tpu.memory_space<vmem>>, vector<8x128xf32>
    %141 = arith.mulf %139, %140 : vector<8x128xf32>
    %c64_i32_32 = arith.constant 64 : i32
    %142 = tpu.dynamic_rotate %141 by %c64_i32_32 dim 1 : vector<8x128xf32>, i32 -> vector<8x128xf32>
    %143 = arith.addf %141, %142 : vector<8x128xf32>
    %c32_i32_33 = arith.constant 32 : i32
    %144 = tpu.dynamic_rotate %143 by %c32_i32_33 dim 1 : vector<8x128xf32>, i32 -> vector<8x128xf32>
    %145 = arith.addf %143, %144 : vector<8x128xf32>
    %c16_i32 = arith.constant 16 : i32
    %146 = tpu.dynamic_rotate %145 by %c16_i32 dim 1 : vector<8x128xf32>, i32 -> vector<8x128xf32>
    %147 = arith.addf %145, %146 : vector<8x128xf32>
    %c8_i32 = arith.constant 8 : i32
    %148 = tpu.dynamic_rotate %147 by %c8_i32 dim 1 : vector<8x128xf32>, i32 -> vector<8x128xf32>
    %149 = arith.addf %147, %148 : vector<8x128xf32>
    %c4_i32_34 = arith.constant 4 : i32
    %150 = tpu.dynamic_rotate %149 by %c4_i32_34 dim 1 : vector<8x128xf32>, i32 -> vector<8x128xf32>
    %151 = arith.addf %149, %150 : vector<8x128xf32>
    %152 = vector.extract_strided_slice %151 {offsets = [0, 0], sizes = [8, 4], strides = [1, 1]} : vector<8x128xf32> to vector<8x4xf32>
    %153 = arith.addf %127, %152 : vector<8x4xf32>
    %c0_35 = arith.constant 0 : index
    %c0_36 = arith.constant 0 : index
    %154 = vector.load %arg6[%c0_35, %c0_36] : memref<8x4xf32, #tpu.memory_space<vmem>>, vector<8x4xf32>
    tpu.vector_store %arg6[%c0_35, %c0_36], %153 {strides = array<i32>} : memref<8x4xf32, #tpu.memory_space<vmem>>, vector<8x4xf32>,
    return
  }
  func.func @transform_0(%arg0: i32) -> (i32, i32) {
    %c0_i32 = arith.constant 0 : i32
    %c0_i32_0 = arith.constant 0 : i32
    return %arg0, %c0_i32 : i32, i32
  }
  func.func @transform_1(%arg0: i32) -> (i32, i32) {
    %c0_i32 = arith.constant 0 : i32
    %c0_i32_0 = arith.constant 0 : i32
    return %arg0, %c0_i32 : i32, i32
  }
  func.func @transform_2(%arg0: i32) -> (i32, i32) {
    %c0_i32 = arith.constant 0 : i32
    %c0_i32_0 = arith.constant 0 : i32
    return %arg0, %c0_i32 : i32, i32
  }
  func.func @transform_3(%arg0: i32) -> (i32, i32) {
    %c0_i32 = arith.constant 0 : i32
    %c0_i32_0 = arith.constant 0 : i32
    return %arg0, %c0_i32 : i32, i32
  }
  func.func @transform_4(%arg0: i32) -> (i32, i32) {
    %c0_i32 = arith.constant 0 : i32
    %c0_i32_0 = arith.constant 0 : i32
    return %arg0, %c0_i32 : i32, i32
  }
  func.func @transform_5(%arg0: i32) -> (i32, i32) {
    %c0_i32 = arith.constant 0 : i32
    %c0_i32_0 = arith.constant 0 : i32
    return %arg0, %c0_i32 : i32, i32
  }
}

</mosaic_0001>

<bundles_post_ra>
// kernel: tpu_custom_call.1
= control target key start
LH: loop header
LB: loop body
LE: loop exit
PB: predicated region body
PF: predicated region fallthrough
CT: control target
= control target key end

     0   :  { %10 = vsyncpa [#allocation3], 0  ;;  %s11275_s0 = inlined_call_operand.hbm [shape: f32[2,32], index: 0, kind: input, shape index: {}]   ;;  %s11276_s1 = inlined_call_operand.hbm [shape: f32[2,1056], index: 1, kind: input, shape index: {}]   ;;  %s11277_s2 = inlined_call_operand.hbm [shape: f32[2,1056], index: 2, kind: input, shape index: {}]   ;;  %s11278_s3 = inlined_call_operand.hbm [shape: f32[2,1056], index: 3, kind: input, shape index: {}]   ;;  %s11279_s4 = inlined_call_operand.vmem [shape: f32[2,132], index: 4, kind: input, shape index: {}]   ;;  %s11280_s5 = inlined_call_operand.hbm [shape: f32[2,4], index: 5, kind: output, shape index: {}]  }
   0x1   :  { %11 = vsyncpa [#allocation6], 0 }
   0x2   :  { %12 = vsyncpa [#allocation9], 0 }
   0x3   :  { %13 = vsyncpa [#allocation4], 0 }
   0x4   :  { %18 = vsyncadd [#allocation3], 96  ;;  %s9411_s18 = smov [#allocation2]   ;;  %s9293_s22 = scalar_lea.hbm %s11275_s0, 32 }
   0x5   :  { %s19_s19 = sshll.u32 %s9411_s18, 4  ;;  %p9294_p0 = scmp.ne.s32.totalorder %s11275_s0, %s9293_s22  ;;  %s20_s19 = int_to_ptr.vmem [resolvable:$true] %s19_s19 }
   0x6   :  { %p9297_p1 = scmp.lt.u32.totalorder %s9293_s22, %s11275_s0 }
   0x8   :  { %p9299_p2 = pnand %p9297_p1, %p9294_p0 }
   0xa   :  { %9302 = shalt.err (!%p9299_p2)
}
   0xb   :  { %s9303_s27 = scalar_lea.vmem %s20_s19, 32  ;;  %s9307_s28 = scalar_lea.vmem %s20_s19, 128 }
   0xc   :  { %p9304_p3 = scmp.ne.s32.totalorder %s20_s19, %s9303_s27  ;;  %p9308_p4 = scmp.lt.s32.totalorder %s20_s19, %s20_s19 }
   0xd   :  { %p9309_p5 = scmp.lt.s32.totalorder %s9307_s28, %s9303_s27 }
   0xf   :  { %p9310_p6 = por %p9309_p5, %p9308_p4 }
  0x11   :  { %p9311_p7 = pnand %p9310_p6, %p9304_p3 }
  0x13   :  { %9314 = shalt.err (!%p9311_p7)
}
  0x14   :  { %s9412_s29 = smov 32   ;;  %s9413_s30 = smov 2  }
  0x15   :  { %25 = dma.hbm_to_vmem [thread:$0]  %s11275_s0, 32, %s20_s19, [#allocation3], %s9412_s29, %s9412_s29, %s9413_s30  }
  0x16   :  { %30 = vsyncadd [#allocation6], 864  ;;  %s9414_s8 = smov [#allocation5]   ;;  %s9315_s12 = scalar_lea.hbm %s11276_s1, 288 }
  0x17   :  { %s31_s9 = sshll.u32 %s9414_s8, 4  ;;  %p9316_p8 = scmp.ne.s32.totalorder %s11276_s1, %s9315_s12  ;;  %s32_s9 = int_to_ptr.vmem [resolvable:$true] %s31_s9 }
  0x18   :  { %p9319_p9 = scmp.lt.u32.totalorder %s9315_s12, %s11276_s1 }
  0x1a   :  { %p9321_p10 = pnand %p9319_p9, %p9316_p8 }
  0x1c   :  { %9324 = shalt.err (!%p9321_p10)
}
  0x1d   :  { %s9325_s17 = scalar_lea.vmem %s32_s9, 288  ;;  %s9329_s0 = scalar_lea.vmem %s32_s9, 1152 }
  0x1e   :  { %p9326_p11 = scmp.ne.s32.totalorder %s32_s9, %s9325_s17  ;;  %p9330_p12 = scmp.lt.s32.totalorder %s32_s9, %s32_s9 }
  0x1f   :  { %p9331_p13 = scmp.lt.s32.totalorder %s9329_s0, %s9325_s17 }
  0x21   :  { %p9332_p0 = por %p9331_p13, %p9330_p12 }
  0x23   :  { %p9333_p1 = pnand %p9332_p0, %p9326_p11 }
  0x25   :  { %9336 = shalt.err (!%p9333_p1)
}
  0x26   :  { %s9415_s18 = smov 288   ;;  %s9416_s19 = smov 18  }
  0x27   :  { %37 = dma.hbm_to_vmem [thread:$0]  %s11276_s1, 288, %s32_s9, [#allocation6], %s9415_s18, %s9415_s18, %s9416_s19  }
  0x28   :  { %42 = vsyncadd [#allocation6], 864  ;;  %s9417_s22 = smov [#allocation7]   ;;  %s9337_s26 = scalar_lea.hbm %s11277_s2, 288 }
  0x29   :  { %s43_s23 = sshll.u32 %s9417_s22, 4  ;;  %p9338_p2 = scmp.ne.s32.totalorder %s11277_s2, %s9337_s26  ;;  %s44_s23 = int_to_ptr.vmem [resolvable:$true] %s43_s23 }
  0x2a   :  { %p9341_p3 = scmp.lt.u32.totalorder %s9337_s26, %s11277_s2 }
  0x2c   :  { %p9343_p4 = pnand %p9341_p3, %p9338_p2 }
  0x2e   :  { %9346 = shalt.err (!%p9343_p4)
}
  0x2f   :  { %s9347_s8 = scalar_lea.vmem %s44_s23, 288  ;;  %s9351_s1 = scalar_lea.vmem %s44_s23, 1152 }
  0x30   :  { %p9348_p5 = scmp.ne.s32.totalorder %s44_s23, %s9347_s8  ;;  %p9352_p6 = scmp.lt.s32.totalorder %s44_s23, %s44_s23 }
  0x31   :  { %p9353_p7 = scmp.lt.s32.totalorder %s9351_s1, %s9347_s8 }
  0x33   :  { %p9354_p8 = por %p9353_p7, %p9352_p6 }
  0x35   :  { %p9355_p9 = pnand %p9354_p8, %p9348_p5 }
  0x37   :  { %9358 = shalt.err (!%p9355_p9)
}
  0x38   :  { %49 = dma.hbm_to_vmem [thread:$0]  %s11277_s2, 288, %s44_s23, [#allocation6], %s9415_s18, %s9415_s18, %s9416_s19  }
  0x39   :  { %54 = vsyncadd [#allocation9], 864  ;;  %s9418_s11 = smov [#allocation8]   ;;  %s9359_s15 = scalar_lea.hbm %s11278_s3, 288 }
  0x3a   :  { %s55_s12 = sshll.u32 %s9418_s11, 4  ;;  %p9360_p10 = scmp.ne.s32.totalorder %s11278_s3, %s9359_s15  ;;  %s56_s12 = int_to_ptr.vmem [resolvable:$true] %s55_s12 }
  0x3b   :  { %p9363_p11 = scmp.lt.u32.totalorder %s9359_s15, %s11278_s3 }
  0x3d   :  { %p9365_p12 = pnand %p9363_p11, %p9360_p10 }
  0x3f   :  { %9368 = shalt.err (!%p9365_p12)
}
  0x40   :  { %s9369_s21 = scalar_lea.vmem %s56_s12, 288  ;;  %s9373_s2 = scalar_lea.vmem %s56_s12, 1152 }
  0x41   :  { %p9370_p13 = scmp.ne.s32.totalorder %s56_s12, %s9369_s21  ;;  %p9374_p0 = scmp.lt.s32.totalorder %s56_s12, %s56_s12 }
  0x42   :  { %p9375_p1 = scmp.lt.s32.totalorder %s9373_s2, %s9369_s21 }
  0x44   :  { %p9376_p2 = por %p9375_p1, %p9374_p0 }
  0x46   :  { %p9377_p3 = pnand %p9376_p2, %p9370_p13 }
  0x48   :  { %9380 = shalt.err (!%p9377_p3)
}
  0x49   :  { %61 = dma.hbm_to_vmem [thread:$0]  %s11278_s3, 288, %s56_s12, [#allocation9], %s9415_s18, %s9415_s18, %s9416_s19  }
  0x4a   :  { %9403 = dma.done.wait [#allocation3], 128  }
  0x4b   :  { %9404 = vsyncadd [#allocation3], 4294967168 }
  0x4c   :  { %9405 = dma.done.wait [#allocation6], 2304  }
  0x4d   :  { %9406 = vsyncadd [#allocation6], 4294964992 }
  0x4e   :  { %9407 = dma.done.wait [#allocation9], 1152  }
  0x4f   :  { %9408 = vsyncadd [#allocation9], 4294966144  ;;  %v81_v0 = vlaneseq  ;;  %v11311_v3 = vmov 0.0   ;;  %v76_v13 = vld [vmem:[#allocation2] sm:$0xff]  ;;  %vm11281_vm2 = vcmask 261120   ;;  %v11395_v22 = vmov 0 }
  0x50   :  { %339 = vmatprep.mubr.f32.mxu1 %v11311_v3  ;;  %624 = vmatprep.mubr.f32.mxu0 %v11311_v3  ;;  %v265_v21 = vsel %vm11281_vm2, %v76_v13, 0  ;;  %v11292_v25 = vmov 1.0|1.0   ;;  %v11397_v29 = vmov 0  ;;  %v11399_v40 = vmov 0  ;;  %s9422_s3 = smov 64  }
  0x51   :  { %v9519_v1 = vshrl.u32 %v81_v0, 7  ;;  %v9521_v2 = vand.u32 127, %v81_v0  ;;  %v9604_v23 = vand.u32 4294901760, %v265_v21  ;;  %v11405_v54 = vmov 0  ;;  %s9425_s26 = smov 16   ;;  %s9426_s27 = smov 8  }
  0x52   :  { %s9427_s28 = smov 4  }
  0x53   :  { %11386 = vst [vmem:[#allocation15_spill] sm:$0xff] %v9519_v1  ;;  %11387 = vst [vmem:[#allocation16_spill] sm:$0xff] %v9521_v2  ;;  %v9526_v4 = vadd.s32 8, %v9519_v1  ;;  %v88_v5 = vadd.s32 128, %v9521_v2  ;;  %v9530_v6 = vmul.u32 32, %v9519_v1  ;;  %v9533_v7 = vadd.s32 16, %v9519_v1 }
  0x54   :  { %v9536_v8 = vadd.s32 24, %v9519_v1  ;;  %v9559_v15 = vadd.s32 384, %v9521_v2  ;;  %v9573_v18 = vadd.s32 256, %v9521_v2  ;;  %v9633_v30 = vsub.f32 %v265_v21, %v9604_v23 }
  0x55   :  { %11388 = vst [vmem:[#allocation17_spill] sm:$0xff] %v9526_v4  ;;  %11389 = vst [vmem:[#allocation18_spill] sm:$0xff] %v9533_v7  ;;  %v9539_v9 = vmul.u32 32, %v9526_v4  ;;  %vm100_vm0 = vcmp.ge.s32.totalorder %v88_v5, %v9530_v6  ;;  %v9543_v10 = vadd.s32 32, %v9530_v6  ;;  %vm99_vm1 = vcmp.ge.s32.totalorder %v9521_v2, %v9530_v6 }
  0x56   :  { %11390 = vst [vmem:[#allocation19_spill] sm:$0xff] %v9536_v8  ;;  %v9548_v11 = vmul.u32 32, %v9533_v7  ;;  %v9551_v12 = vmul.u32 32, %v9536_v8  ;;  %v9657_v36 = vand.u32 4294901760, %v9633_v30  ;;  %v9692_v49 = vadd.s32 640, %v9521_v2 }
  0x57   :  { %vm108_vm3 = vcmp.ge.s32.totalorder %v88_v5, %v9539_v9  ;;  %v9555_v14 = vadd.s32 32, %v9539_v9  ;;  %vm136_vm4 = vcmp.lt.s32.totalorder %v88_v5, %v9543_v10  ;;  %vm107_vm6 = vcmp.ge.s32.totalorder %v9521_v2, %v9539_v9 }
  0x58   :  { %vm9561_vm5 = vmand %vm100_vm0, %vm136_vm4  ;;  %vm135_vm7 = vcmp.lt.s32.totalorder %v9521_v2, %v9543_v10  ;;  %v9570_v17 = vadd.s32 32, %v9548_v11  ;;  %vm116_vm11 = vcmp.ge.s32.totalorder %v88_v5, %v9548_v11  ;;  %v9587_v20 = vadd.s32 32, %v9551_v12 }
  0x59   :  { %vm144_vm8 = vcmp.lt.s32.totalorder %v88_v5, %v9555_v14  ;;  %vm143_vm9 = vcmp.lt.s32.totalorder %v9521_v2, %v9555_v14  ;;  %vm9581_vm10 = vmand %vm99_vm1, %vm135_vm7  ;;  %vm124_vm13 = vcmp.ge.s32.totalorder %v88_v5, %v9551_v12  ;;  %vm115_vm15 = vcmp.ge.s32.totalorder %v9521_v2, %v9548_v11 }
  0x5a   :  { %vm176_vm12 = vmand %vm108_vm3, %vm144_vm8  ;;  %vm152_vm14 = vcmp.lt.s32.totalorder %v88_v5, %v9570_v17  ;;  %vm123_vm1 = vcmp.ge.s32.totalorder %v9521_v2, %v9551_v12  ;;  %vm151_vm3 = vcmp.lt.s32.totalorder %v9521_v2, %v9570_v17  ;;  %v8002_v24 = vsel %vm9561_vm5, 1.0, %v11311_v3 }
  0x5b   :  { %vm9596_vm0 = vmpackc.low %vm176_vm12, %vm9561_vm5  ;;  %vm160_vm7 = vcmp.lt.s32.totalorder %v88_v5, %v9587_v20  ;;  %v8010_v26 = vsel %vm176_vm12, 1.0, %v11311_v3  ;;  %v352_v27 = vsub.f32 %v8002_v24, %v8002_v24  ;;  %v8001_v28 = vsel %vm9581_vm10, 1.0, %v11311_v3 }
  0x5c   :  { %v11396_v22 = vsel %vm9596_vm0, 4294967295, %v11395_v22  ;;  %8446 = vmatprep.subr.msk.bf16.mxu1 %vm9596_vm0, %v11292_v25  ;;  %8470 = vmatprep.subr.msk.bf16.mxu0 %vm9596_vm0, %v11292_v25  ;;  %vm175_vm4 = vmand %vm107_vm6, %vm143_vm9  ;;  %v364_v31 = vsub.f32 %v8010_v26, %v8010_v26  ;;  %v358_v33 = vsub.f32 %v8001_v28, %v8001_v28  ;;  %vm159_vm8 = vcmp.lt.s32.totalorder %v9521_v2, %v9587_v20 }
  0x5d   :  { %vm9628_vm5 = vmpackc.low %vm175_vm4, %vm9581_vm10  ;;  %v8009_v32 = vsel %vm175_vm4, 1.0, %v11311_v3  ;;  %v353_v34 = vand.u32 4294901760, %v352_v27  ;;  %vm102_vm9 = vcmp.ge.s32.totalorder %v9559_v15, %v9530_v6  ;;  %vm138_vm10 = vcmp.lt.s32.totalorder %v9559_v15, %v9543_v10 }
  0x5e   :  { %v11398_v29 = vsel %vm9628_vm5, 4294967295, %v11397_v29  ;;  %8448 = vmatpush1.bf16.msk.msra.mxu1 %vm9628_vm5, %v11292_v25  ;;  %8472 = vmatpush1.bf16.msk.msra.mxu0 %vm9628_vm5, %v11292_v25  ;;  %vm184_vm6 = vmand %vm116_vm11, %vm152_vm14  ;;  %v370_v35 = vsub.f32 %v8009_v32, %v8009_v32  ;;  %v365_v37 = vand.u32 4294901760, %v364_v31  ;;  %v359_v38 = vand.u32 4294901760, %v358_v33 }
  0x5f   :  { %vm192_vm12 = vmand %vm124_vm13, %vm160_vm7  ;;  %v8018_v39 = vsel %vm184_vm6, 1.0, %v11311_v3  ;;  %vm110_vm11 = vcmp.ge.s32.totalorder %v9559_v15, %v9539_v9  ;;  %vm146_vm14 = vcmp.lt.s32.totalorder %v9559_v15, %v9555_v14  ;;  %v354_v41 = vsub.f32 %v352_v27, %v353_v34 }
  0x60   :  { %vm9664_vm4 = vmpackc.low %vm192_vm12, %vm184_vm6  ;;  %v371_v42 = vand.u32 4294901760, %v370_v35  ;;  %v8026_v43 = vsel %vm192_vm12, 1.0, %v11311_v3  ;;  %v376_v44 = vsub.f32 %v8018_v39, %v8018_v39  ;;  %vm101_vm13 = vcmp.ge.s32.totalorder %v9573_v18, %v9530_v6 }
  0x61   :  { %v11400_v40 = vsel %vm9664_vm4, 4294967295, %v11399_v40  ;;  %8450 = vmatprep.subr.msk.bf16.mxu1 %vm9664_vm4, %v11292_v25  ;;  %8474 = vmatprep.subr.msk.bf16.mxu0 %vm9664_vm4, %v11292_v25  ;;  %vm9683_vm7 = vmand %vm115_vm15, %vm151_vm3  ;;  %v343_v46 = vsub.f32 %v9633_v30, %v9657_v36  ;;  %v366_v47 = vsub.f32 %v364_v31, %v365_v37  ;;  %v9689_v48 = vpack.c.bf16 %v365_v37, %v353_v34 }
  0x62   :  { %vm191_vm6 = vmand %vm123_vm1, %vm159_vm8  ;;  %v355_v50 = vand.u32 4294901760, %v354_v41  ;;  %v360_v51 = vsub.f32 %v358_v33, %v359_v38  ;;  %v372_v52 = vsub.f32 %v370_v35, %v371_v42  ;;  %v9700_v53 = vpack.c.bf16 %v371_v42, %v359_v38 }
  0x63   :  { %11403 = vst [vmem:[#allocation20_spill] sm:$0xff] %v9689_v48  ;;  %vm9704_vm15 = vmpackc.low %vm191_vm6, %vm9683_vm7  ;;  %v9708_v55 = vand.u32 4294901760, %v343_v46  ;;  %v367_v56 = vand.u32 4294901760, %v366_v47  ;;  %v377_v57 = vand.u32 4294901760, %v376_v44  ;;  %v388_v58 = vsub.f32 %v8026_v43, %v8026_v43  ;;  %v9231_v46 = vld [vmem:[#allocation8 + $0x24] ss:$18 sps:$4 sm:$0xff]  }
  0x64   :  { %11404 = vst [vmem:[#allocation21_spill] sm:$0xff] %v9700_v53  ;;  %v11406_v54 = vsel %vm9704_vm15, 4294967295, %v11405_v54  ;;  %8452 = vmatpush1.bf16.msk.msra.mxu1 %vm9704_vm15, %v11292_v25  ;;  %8476 = vmatpush1.bf16.msk.msra.mxu0 %vm9704_vm15, %v11292_v25  ;;  %v361_v59 = vand.u32 4294901760, %v360_v51  ;;  %v373_v60 = vand.u32 4294901760, %v372_v52  ;;  %v8017_v61 = vsel %vm9683_vm7, 1.0, %v11311_v3  ;;  %vm9749_vm3 = vmand %vm102_vm9, %vm138_vm10 }
  0x65   :  { %v8025_v62 = vsel %vm191_vm6, 1.0, %v11311_v3  ;;  %v9720_v63 = vpack.c.bf16 %v367_v56, %v355_v50  ;;  %8478 = vmatprep.subr.bf16.mxu0 %v9689_v48  ;;  %v378_v0 = vsub.f32 %v376_v44, %v377_v57  ;;  %v389_v5 = vand.u32 4294901760, %v388_v58  ;;  %vm9767_vm9 = vmand %vm110_vm11, %vm146_vm14 }
  0x66   :  { %v382_v13 = vsub.f32 %v8017_v61, %v8017_v61  ;;  %v9723_v16 = vpack.c.bf16 %v373_v60, %v361_v59  ;;  %v394_v19 = vsub.f32 %v8025_v62, %v8025_v62  ;;  %v9725_v21 = vpack.c.bf16 %v364_v31, %v352_v27  ;;  %v9229_v59 = vld [vmem:[#allocation8] ss:$18 sps:$4 sm:$0xff]  }
  0x67   :  { %11407 = vst [vmem:[#allocation22_spill] sm:$0xff] %v9720_v63  ;;  %v9727_v24 = vpack.c.bf16 %v370_v35, %v358_v33  ;;  %345 = vmatmul.mubr.f32.vlgmr.msra.gmra.mrb[0].mxu1 %v9708_v55  ;;  %8454 = vmatprep.subr.bf16.mxu1 %v9720_v63  ;;  %v379_v26 = vand.u32 4294901760, %v378_v0  ;;  %v390_v28 = vsub.f32 %v388_v58, %v389_v5  ;;  %v9774_v43 = vadd.s32 512, %v9521_v2 }
  0x68   :  { %11408 = vst [vmem:[#allocation23_spill] sm:$0xff] %v9725_v21  ;;  %v9731_v32 = vpack.c.bf16 %v389_v5, %v377_v57  ;;  %v383_v34 = vand.u32 4294901760, %v382_v13  ;;  %628 = vmatmul.mubr.f32.vlgmr.msra.gmra.mrb[0].mxu0 %v9657_v36  ;;  %8456 = vmatpush1.bf16.msra.mxu1 %v9723_v16  ;;  %v395_v37 = vand.u32 4294901760, %v394_v19  ;;  %v9735_v38 = vpack.c.bf16 %v388_v58, %v376_v44 }
  0x69   :  { %11409 = vst [vmem:[#allocation24_spill] sm:$0xff] %v9727_v24  ;;  %v9737_v27 = vpack.c.bf16 %v394_v19, %v382_v13  ;;  %vm109_vm1 = vcmp.ge.s32.totalorder %v9573_v18, %v9539_v9  ;;  %8480 = vmatpush1.bf16.msra.mxu0 %v9700_v53  ;;  %v391_v31 = vand.u32 4294901760, %v390_v28  ;;  %455 = vmatprep.mubr.f32.mxu1 %v11311_v3  ;;  %v8004_v58 = vsel %vm9749_vm3, 1.0, %v11311_v3 }
  0x6a   :  { %11410 = vst [vmem:[#allocation25_spill] sm:$0xff] %v9731_v32  ;;  %11411 = vst [vmem:[#allocation26_spill] sm:$0xff] %v9735_v38  ;;  %v384_v33 = vsub.f32 %v382_v13, %v383_v34  ;;  %vm137_vm8 = vcmp.lt.s32.totalorder %v9573_v18, %v9543_v10  ;;  %vm145_vm12 = vcmp.lt.s32.totalorder %v9573_v18, %v9555_v14  ;;  %8482 = vmatprep.subr.bf16.mxu0 %v9731_v32  ;;  %v11476_v7 = vmov 1.0|1.0  }
  0x6b   :  { %11412 = vst [vmem:[#allocation27_spill] sm:$0xff] %v9737_v27  ;;  %v396_v39 = vsub.f32 %v394_v19, %v395_v37  ;;  %v9758_v41 = vpack.c.bf16 %v395_v37, %v383_v34  ;;  %722 = vmatprep.mubr.f32.mxu0 %v11311_v3  ;;  %vm104_vm10 = vcmp.ge.s32.totalorder %v9692_v49, %v9530_v6  ;;  %vm9781_vm7 = vmand %vm101_vm13, %vm137_vm8  ;;  %v8012_v61 = vsel %vm9767_vm9, 1.0, %v11311_v3 }
  0x6c   :  { %v9776_v44 = vpack.c.bf16 %v391_v31, %v379_v26  ;;  %v385_v45 = vand.u32 4294901760, %v384_v33  ;;  %vm140_vm14 = vcmp.lt.s32.totalorder %v9692_v49, %v9543_v10  ;;  %vm9792_vm6 = vmand %vm109_vm1, %vm145_vm12  ;;  %vm148_vm13 = vcmp.lt.s32.totalorder %v9692_v49, %v9555_v14 }
  0x6d   :  { %11415 = vst [vmem:[#allocation28_spill] sm:$0xff] %v9758_v41  ;;  %v397_v47 = vand.u32 4294901760, %v396_v39  ;;  %8484 = vmatpush1.bf16.msra.mxu0 %v9758_v41  ;;  %vm9804_vm11 = vmand %vm104_vm10, %vm140_vm14  ;;  %vm11428_vm14 = vcmp.ge.s32.totalorder %v9692_v49, %v9539_v9  ;;  %vm11433_vm12 = vcmp.lt.s32.totalorder %v9559_v15, %v9570_v17  ;;  %v9902_v5 = vsub.f32 %v8004_v58, %v8004_v58 }
  0x6e   :  { %11418 = vst [vmem:[#allocation29_spill] sm:$0xff] %v9776_v44  ;;  %8458 = vmatprep.subr.bf16.mxu1 %v9776_v44  ;;  %8486 = vmatprep.subr.msk.bf16.mxu0 %vm9596_vm0, %v11292_v25  ;;  %vm9823_vm10 = vmpackc.low %vm9767_vm9, %vm9749_vm3  ;;  %vm11434_vm0 = vcmp.ge.s32.totalorder %v9559_v15, %v9548_v11  ;;  %vm11440_vm9 = vcmp.ge.s32.totalorder %v9559_v15, %v9551_v12  ;;  %v8003_v19 = vsel %vm9781_vm7, 1.0, %v11311_v3  ;;  %v8011_v26 = vsel %vm9792_vm6, 1.0, %v11311_v3 }
  0x6f   :  { %v9814_v52 = vpack.c.bf16 %v397_v47, %v385_v45  ;;  %vm9830_vm2 = vmand %vm11428_vm14, %vm148_vm13  ;;  %v9904_v13 = vsub.f32 %v8012_v61, %v8012_v61  ;;  %vm11445_vm8 = vcmp.lt.s32.totalorder %v9774_v43, %v9543_v10  ;;  %v11289_v34 = vand.u32 4294901760, %v9902_v5 }
  0x70   :  { %vm9845_vm1 = vmpackc.low %vm9830_vm2, %vm9804_vm11  ;;  %724 = vmatmul.mubr.f32.vlgmr.msra.gmra.mrb[0].mxu0 %v9604_v23  ;;  %v9945_v31 = vsub.f32 %v8003_v19, %v8003_v19  ;;  %v9959_v35 = vsub.f32 %v8011_v26, %v8011_v26  ;;  %v8006_v39 = vsel %vm9804_vm11, 1.0, %v11311_v3  ;;  %v8014_v42 = vsel %vm9830_vm2, 1.0, %v11311_v3 }
  0x71   :  { %11425 = vst [vmem:[#allocation30_spill] sm:$0xff] %v9814_v52  ;;  %8460 = vmatpush1.bf16.msra.mxu1 %v9814_v52  ;;  %vm9865_vm13 = vmand %vm11434_vm0, %vm11433_vm12  ;;  %8488 = vmatpush1.bf16.msk.msra.mxu0 %vm9628_vm5, %v11292_v25  ;;  %vm11439_vm12 = vcmp.lt.s32.totalorder %v9559_v15, %v9587_v20  ;;  %v11288_v37 = vand.u32 4294901760, %v9904_v13  ;;  %v897_v47 = vsub.f32 %v9902_v5, %v11289_v34 }
  0x72   :  { %8462 = vmatprep.subr.bf16.mxu1 %v9725_v21  ;;  %vm9886_vm0 = vmpackc.low %vm9792_vm6, %vm9781_vm7  ;;  %8490 = vmatprep.subr.msk.bf16.mxu0 %vm9664_vm4, %v11292_v25  ;;  %vm11446_vm4 = vcmp.ge.s32.totalorder %v9774_v43, %v9530_v6  ;;  %vm11449_vm6 = vcmp.lt.s32.totalorder %v9774_v43, %v9555_v14  ;;  %v8020_v45 = vsel %vm9865_vm13, 1.0, %v11311_v3  ;;  %v11290_v51 = vand.u32 4294901760, %v9945_v31 }
  0x73   :  { %vm9896_vm3 = vmand %vm11440_vm9, %vm11439_vm12  ;;  %802 = vmatprep.mubr.f32.mxu0 %v11311_v3  ;;  %vm164_vm9 = vcmp.lt.s32.totalorder %v9692_v49, %v9587_v20  ;;  %v909_v50 = vsub.f32 %v9904_v13, %v11288_v37  ;;  %v9989_v57 = vsub.f32 %v8006_v39, %v8006_v39  ;;  %vm11455_vm2 = vcmp.lt.s32.totalorder %v9573_v18, %v9570_v17 }
  0x74   :  { %vm9917_vm12 = vmpackc.low %vm9896_vm3, %vm9865_vm13  ;;  %457 = vmatmul.mubr.f32.vlgmr.msra.gmra.mrb[0].mxu1 %v9604_v23  ;;  %vm11456_vm11 = vcmp.ge.s32.totalorder %v9573_v18, %v9548_v11  ;;  %v11291_v60 = vand.u32 4294901760, %v9959_v35  ;;  %v10005_v61 = vsub.f32 %v8014_v42, %v8014_v42  ;;  %v8028_v19 = vsel %vm9896_vm3, 1.0, %v11311_v3 }
  0x75   :  { %vm9937_vm5 = vmand %vm11446_vm4, %vm11445_vm8  ;;  %8464 = vmatpush1.bf16.msra.mxu1 %v9727_v24  ;;  %543 = vmatprep.mubr.f32.mxu1 %v11311_v3  ;;  %vm11450_vm4 = vcmp.ge.s32.totalorder %v9774_v43, %v9539_v9  ;;  %v10010_v26 = vsub.f32 %v8020_v45, %v8020_v45  ;;  %vm11460_vm7 = vcmp.ge.s32.totalorder %v9573_v18, %v9551_v12  ;;  %v898_v37 = vand.u32 4294901760, %v897_v47 }
  0x76   :  { %vm9955_vm8 = vmand %vm11450_vm4, %vm11449_vm6  ;;  %8466 = vmatprep.subr.bf16.mxu1 %v9735_v38  ;;  %8492 = vmatpush1.bf16.msk.msra.mxu0 %vm9704_vm15, %v11292_v25  ;;  %vm11459_vm4 = vcmp.lt.s32.totalorder %v9573_v18, %v9587_v20  ;;  %v910_v34 = vand.u32 4294901760, %v909_v50  ;;  %v903_v42 = vsub.f32 %v9945_v31, %v11290_v51  ;;  %v11294_v0 = vand.u32 4294901760, %v9989_v57 }
  0x77   :  { %vm9978_vm6 = vmpackc.low %vm9955_vm8, %vm9937_vm5  ;;  %8542 = vmatprep.subr.msk.bf16.mxu0 %vm9845_vm1, %v11292_v25  ;;  %v915_v45 = vsub.f32 %v9959_v35, %v11291_v60  ;;  %v11297_v47 = vand.u32 4294901760, %v10005_v61  ;;  %v10041_v51 = vsub.f32 %v8028_v19, %v8028_v19  ;;  %v11473_v28 = vand.u32 4294901760, %v10010_v26 }
  0x78   :  { %vm10000_vm13 = vmand %vm11456_vm11, %vm11455_vm2  ;;  %vm11466_vm11 = vcmp.ge.s32.totalorder %v9692_v49, %v9548_v11  ;;  %v10059_v19 = vpack.c.bf16 %v910_v34, %v898_v37  ;;  %v1440_v50 = vsub.f32 %v9989_v57, %v11294_v0  ;;  %v904_v37 = vand.u32 4294901760, %v903_v42 }
  0x79   :  { %vm10018_vm2 = vmand %vm11460_vm7, %vm11459_vm4  ;;  %8468 = vmatpush1.bf16.msra.mxu1 %v9737_v27  ;;  %804 = vmatmul.mubr.f32.vlgmr.msra.gmra.mrb[0].mxu0 %v9604_v23  ;;  %vm11465_vm7 = vcmp.lt.s32.totalorder %v9692_v49, %v9570_v17  ;;  %v1452_v0 = vsub.f32 %v10005_v61, %v11297_v47  ;;  %v921_v8 = vsub.f32 %v10010_v26, %v11473_v28  ;;  %v8013_v47 = vsel %vm9955_vm8, 1.0, %v11311_v3 }
  0x7a   :  { %vm10032_vm3 = vmpackc.low %vm10018_vm2, %vm10000_vm13  ;;  %8494 = vmatprep.subr.msk.bf16.mxu1 %vm9823_vm10, %v11292_v25  ;;  %8544 = vmatpush1.bf16.msk.msra.mxu0 %vm9978_vm6, %v11292_v25  ;;  %11469 = vst [vmem:[#allocation31_spill] sm:$0xff] %v10059_v19  ;;  %v8005_v25 = vsel %vm9937_vm5, 1.0, %v11311_v3  ;;  %v1441_v42 = vand.u32 4294901760, %v1440_v50  ;;  %v8019_v28 = vsel %vm10000_vm13, 1.0, %v11311_v3  ;;  %v11481_v41 = vand.u32 4294901760, %v10041_v51 }
  0x7b   :  { %vm10055_vm4 = vmand %vm11466_vm11, %vm11465_vm7  ;;  %vm11470_vm7 = vcmp.ge.s32.totalorder %v9692_v49, %v9551_v12  ;;  %1425 = vmatprep.mubr.f32.mxu0 %v11311_v3  ;;  %v10099_v4 = vsub.f32 %v8005_v25, %v8005_v25  ;;  %v916_v25 = vand.u32 4294901760, %v915_v45  ;;  %v1453_v50 = vand.u32 4294901760, %v1452_v0  ;;  %v9233_v49 = vld [vmem:[#allocation8 + $0x4] ss:$18 sps:$4 sm:$0xff]  }
  0x7c   :  { %vm10075_vm11 = vmand %vm11470_vm7, %vm164_vm9  ;;  %546 = vmatmul.mubr.f32.vlgmr.msra.gmra.mrb[0].mxu1 %v9633_v30  ;;  %vm11477_vm9 = vcmp.lt.s32.totalorder %v9774_v43, %v9570_v17  ;;  %vm11478_vm7 = vcmp.ge.s32.totalorder %v9774_v43, %v9548_v11  ;;  %v922_v58 = vand.u32 4294901760, %v921_v8  ;;  %v933_v32 = vsub.f32 %v10041_v51, %v11481_v41 }
  0x7d   :  { %vm10092_vm5 = vmpackc.low %vm10075_vm11, %vm10055_vm4  ;;  %8496 = vmatpush1.bf16.msk.msra.mxu1 %vm9886_vm0, %v11476_v7  ;;  %882 = vmatprep.mubr.f32.mxu1 %v11311_v3  ;;  %vm11482_vm8 = vcmp.lt.s32.totalorder %v9774_v43, %v9587_v20  ;;  %vm11483_vm13 = vcmp.ge.s32.totalorder %v9774_v43, %v9551_v12  ;;  %v10138_v0 = vsub.f32 %v8013_v47, %v8013_v47  ;;  %v8027_v45 = vsel %vm10018_vm2, 1.0, %v11311_v3 }
  0x7e   :  { %vm10114_vm14 = vmand %vm11478_vm7, %vm11477_vm9  ;;  %8498 = vmatprep.subr.msk.bf16.mxu1 %vm9917_vm12, %v11476_v7  ;;  %8546 = vmatprep.subr.msk.bf16.mxu0 %vm10092_vm5, %v11476_v7  ;;  %v10143_v53 = vsub.f32 %v8019_v28, %v8019_v28  ;;  %v11486_v43 = vmov 0  ;;  %v10153_v48 = vpack.c.bf16 %v1453_v50, %v1441_v42  ;;  %v934_v27 = vand.u32 4294901760, %v933_v32 }
  0x7f   :  { %vm10133_vm9 = vmand %vm11483_vm13, %vm11482_vm8  ;;  %v10155_v41 = vsub.f32 %v8027_v45, %v8027_v45  ;;  %v8022_v39 = vsel %vm10055_vm4, 1.0, %v11311_v3  ;;  %v11489_v47 = vand.u32 4294901760, %v10099_v4  ;;  %v11313_v38 = vand.u32 4294901760, %v10138_v0 }
  0x80   :  { %vm10149_vm7 = vmpackc.low %vm10133_vm9, %vm10114_vm14  ;;  %11488 = vst [vmem:[#allocation32_spill] sm:$0xff] %v10153_v48  ;;  %v8030_v32 = vsel %vm10075_vm11, 1.0, %v11311_v3  ;;  %v10174_v60 = vpack.c.bf16 %v916_v25, %v904_v37  ;;  %v10178_v45 = vsub.f32 %v8022_v39, %v8022_v39  ;;  %v10183_v42 = vpack.c.bf16 %v934_v27, %v922_v58 }
  0x81   :  { %v11487_v43 = vsel %vm10149_vm7, 4294967295, %v11486_v43  ;;  %8548 = vmatpush1.bf16.msk.msra.mxu0 %vm10149_vm7, %v11476_v7  ;;  %v1446_v28 = vsub.f32 %v10099_v4, %v11489_v47  ;;  %8500 = vmatpush1.bf16.msk.msra.mxu1 %vm10032_vm3, %v11476_v7  ;;  %v11318_v50 = vand.u32 4294901760, %v10155_v41  ;;  %v10180_v47 = vsub.f32 %v8030_v32, %v8030_v32 }
  0x82   :  { %8550 = vmatprep.subr.bf16.mxu0 %v10153_v48  ;;  %8502 = vmatprep.subr.bf16.mxu1 %v10059_v19  ;;  %v1458_v3 = vsub.f32 %v10138_v0, %v11313_v38  ;;  %v11490_v37 = vand.u32 4294901760, %v10143_v53  ;;  %v11323_v32 = vand.u32 4294901760, %v10178_v45  ;;  %v11491_v58 = vmov 0.0  }
  0x83   :  { %v1447_v34 = vand.u32 4294901760, %v1446_v28  ;;  %v939_v39 = vsub.f32 %v10155_v41, %v11318_v50  ;;  %v11328_v27 = vand.u32 4294901760, %v10180_v47  ;;  %v8021_v28 = vsel %vm10114_vm14, 1.0, %v11491_v58 }
  0x84   :  { %v927_v25 = vsub.f32 %v10143_v53, %v11490_v37  ;;  %1431 = vmatmul.mubr.f32.vlgmr.msra.gmra.mrb[2].mxu0 %v9708_v55  ;;  %888 = vmatmul.mubr.f32.vlgmr.msra.gmra.mrb[2].mxu1 %v9708_v55  ;;  %v1459_v38 = vand.u32 4294901760, %v1458_v3  ;;  %v8029_v37 = vsel %vm10133_vm9, 1.0, %v11491_v58  ;;  %v10204_v24 = vsub.f32 %v8021_v28, %v8021_v28 }
  0x85   :  { %1541 = vmatprep.mubr.f32.mxu0 %v11491_v58  ;;  %8504 = vmatpush1.bf16.msra.mxu1 %v10174_v60  ;;  %v940_v50 = vand.u32 4294901760, %v939_v39  ;;  %v1464_v33 = vsub.f32 %v10178_v45, %v11323_v32  ;;  %v1476_v3 = vsub.f32 %v10180_v47, %v11328_v27  ;;  %v10222_v28 = vpack.c.bf16 %v9904_v13, %v9902_v5 }
  0x86   :  { %v928_v48 = vand.u32 4294901760, %v927_v25  ;;  %998 = vmatprep.mubr.f32.mxu1 %v11491_v58  ;;  %v10215_v25 = vsub.f32 %v8029_v37, %v8029_v37  ;;  %8506 = vmatprep.subr.bf16.mxu1 %v10183_v42  ;;  %v10218_v8 = vpack.c.bf16 %v1459_v38, %v1447_v34  ;;  %v11327_v39 = vand.u32 4294901760, %v10204_v24 }
  0x87   :  { %11493 = vst [vmem:[#allocation34_spill] sm:$0xff] %v10222_v28  ;;  %v1465_v52 = vand.u32 4294901760, %v1464_v33  ;;  %v1477_v32 = vand.u32 4294901760, %v1476_v3  ;;  %v10245_v33 = vpack.c.bf16 %v10041_v51, %v10010_v26  ;;  %v10271_v27 = vpack.c.bf16 %v10180_v47, %v10178_v45 }
  0x88   :  { %11492 = vst [vmem:[#allocation33_spill] sm:$0xff] %v10218_v8  ;;  %v10225_v21 = vpack.c.bf16 %v940_v50, %v928_v48  ;;  %v11326_v44 = vand.u32 4294901760, %v10215_v25  ;;  %8552 = vmatpush1.bf16.msra.mxu0 %v10218_v8  ;;  %v1470_v37 = vsub.f32 %v10204_v24, %v11327_v39  ;;  %v10240_v48 = vpack.c.bf16 %v9959_v35, %v9945_v31 }
  0x89   :  { %v10233_v38 = vpack.c.bf16 %v1477_v32, %v1465_v52  ;;  %11496 = vst [vmem:[#allocation37_spill] sm:$0xff] %v10245_v33  ;;  %v10251_v52 = vpack.c.bf16 %v10005_v61, %v9989_v57  ;;  %v10255_v32 = vpack.c.bf16 %v10138_v0, %v10099_v4  ;;  %11501 = vst [vmem:[#allocation42_spill] sm:$0xff] %v10271_v27 }
  0x8a   :  { %8508 = vmatpush1.bf16.msra.mxu1 %v10225_v21  ;;  %v1482_v34 = vsub.f32 %v10215_v25, %v11326_v44  ;;  %11495 = vst [vmem:[#allocation36_spill] sm:$0xff] %v10240_v48  ;;  %v1471_v50 = vand.u32 4294901760, %v1470_v37  ;;  %v94_v44 = vadd.s32 896, %v9521_v2  ;;  %v10259_v37 = vadd.s32 768, %v9521_v2 }
  0x8b   :  { %11494 = vst [vmem:[#allocation35_spill] sm:$0xff] %v10233_v38  ;;  %8510 = vmatprep.subr.bf16.mxu1 %v10222_v28  ;;  %8554 = vmatprep.subr.bf16.mxu0 %v10233_v38  ;;  %11497 = vst [vmem:[#allocation38_spill] sm:$0xff] %v10251_v52  ;;  %v11504_v2 = vand.u32 4294901760, %v9904_v13  ;;  %v11511_v13 = vand.u32 4294901760, %v10005_v61  ;;  %v11517_v61 = vand.u32 4294901760, %v10138_v0 }
  0x8c   :  { %v1483_v3 = vand.u32 4294901760, %v1482_v34  ;;  %11498 = vst [vmem:[#allocation39_spill] sm:$0xff] %v10255_v32  ;;  %v10266_v34 = vpack.c.bf16 %v10155_v41, %v10143_v53  ;;  %vm106_vm14 = vcmp.ge.s32.totalorder %v94_v44, %v9530_v6  ;;  %vm114_vm2 = vcmp.ge.s32.totalorder %v94_v44, %v9539_v9 }
  0x8d   :  { %1000 = vmatmul.mubr.f32.vlgmr.msra.gmra.mrb[2].mxu1 %v9604_v23  ;;  %vm142_vm4 = vcmp.lt.s32.totalorder %v94_v44, %v9543_v10  ;;  %vm150_vm11 = vcmp.lt.s32.totalorder %v94_v44, %v9555_v14  ;;  %vm141_vm9 = vcmp.lt.s32.totalorder %v10259_v37, %v9543_v10  ;;  %vm158_vm7 = vcmp.lt.s32.totalorder %v94_v44, %v9570_v17 }
  0x8e   :  { %v10261_v39 = vpack.c.bf16 %v1483_v3, %v1471_v50  ;;  %8512 = vmatpush1.bf16.msra.mxu1 %v10240_v48  ;;  %11500 = vst [vmem:[#allocation41_spill] sm:$0xff] %v10266_v34  ;;  %1086 = vmatprep.mubr.f32.mxu1 %v11491_v58  ;;  %v10281_v50 = vpack.c.bf16 %v10215_v25, %v10204_v24  ;;  %v11503_v3 = vand.u32 4294901760, %v9902_v5  ;;  %vm10289_vm8 = vmand %vm106_vm14, %vm142_vm4  ;;  %v11509_v5 = vand.u32 4294901760, %v9959_v35 }
  0x8f   :  { %8514 = vmatprep.subr.bf16.mxu1 %v10245_v33  ;;  %vm182_vm14 = vmand %vm114_vm2, %vm150_vm11  ;;  %v11514_v35 = vand.u32 4294901760, %v10041_v51  ;;  %vm11523_vm4 = vcmp.ge.s32.totalorder %v10259_v37, %v9530_v6  ;;  %vm11524_vm11 = vcmp.lt.s32.totalorder %v10259_v37, %v9555_v14  ;;  %vm166_vm15 = vcmp.lt.s32.totalorder %v94_v44, %v9587_v20 }
  0x90   :  { %11499 = vst [vmem:[#allocation40_spill] sm:$0xff] %v10261_v39  ;;  %8556 = vmatpush1.bf16.msra.mxu0 %v10261_v39  ;;  %11502 = vst [vmem:[#allocation43_spill] sm:$0xff] %v10281_v50  ;;  %v10287_v38 = vpack.c.bf16 %v11504_v2, %v11503_v3  ;;  %v11508_v39 = vand.u32 4294901760, %v9945_v31  ;;  %v11510_v2 = vand.u32 4294901760, %v9989_v57  ;;  %v11513_v31 = vand.u32 4294901760, %v10010_v26 }
  0x91   :  { %8558 = vmatprep.subr.bf16.mxu0 %v10251_v52  ;;  %v11516_v57 = vand.u32 4294901760, %v10099_v4  ;;  %vm10335_vm2 = vmpackc.low %vm182_vm14, %vm10289_vm8  ;;  %v8008_v4 = vsel %vm10289_vm8, 1.0, %v11491_v58  ;;  %v9234_v26 = vld [vmem:[#allocation8 + $0x28] ss:$18 sps:$4 sm:$0xff]  }
  0x92   :  { %11505 = vst [vmem:[#allocation44_spill] sm:$0xff] %v10287_v38  ;;  %v10302_v33 = vpack.c.bf16 %v11509_v5, %v11508_v39  ;;  %v10308_v3 = vpack.c.bf16 %v11511_v13, %v11510_v2  ;;  %8516 = vmatpush1.bf16.msra.mxu1 %v10266_v34  ;;  %v10319_v39 = vpack.c.bf16 %v11514_v35, %v11513_v31  ;;  %v11519_v2 = vand.u32 4294901760, %v10143_v53  ;;  %vm173_vm13 = vmand %vm11523_vm4, %vm141_vm9  ;;  %v11600_v18 = vld [vmem:[#allocation38_spill] sm:$0xff] }
  0x93   :  { %v10325_v5 = vpack.c.bf16 %v11517_v61, %v11516_v57  ;;  %v11520_v13 = vand.u32 4294901760, %v10155_v41  ;;  %1543 = vmatmul.mubr.f32.vlgmr.msra.gmra.mrb[2].mxu0 %v9604_v23  ;;  %8518 = vmatprep.subr.msk.bf16.mxu1 %vm9823_vm10, %v11476_v7  ;;  %v8016_v53 = vsel %vm182_vm14, 1.0, %v11491_v58  ;;  %vm11525_vm9 = vcmp.ge.s32.totalorder %v10259_v37, %v9539_v9 }
  0x94   :  { %11512 = vst [vmem:[#allocation45_spill] sm:$0xff] %v10308_v3  ;;  %11515 = vst [vmem:[#allocation46_spill] sm:$0xff] %v10319_v39  ;;  %8560 = vmatpush1.bf16.msra.mxu0 %v10255_v32  ;;  %1629 = vmatprep.mubr.f32.mxu0 %v11491_v58  ;;  %v10365_v6 = vsub.f32 %v8008_v4, %v8008_v4  ;;  %v10367_v10 = vsub.f32 %v8016_v53, %v8016_v53  ;;  %v8007_v51 = vsel %vm173_vm13, 1.0, %v11491_v58 }
  0x95   :  { %11518 = vst [vmem:[#allocation47_spill] sm:$0xff] %v10325_v5  ;;  %v10331_v52 = vpack.c.bf16 %v11520_v13, %v11519_v2  ;;  %vm181_vm4 = vmand %vm11525_vm9, %vm11524_vm11  ;;  %8562 = vmatprep.subr.bf16.mxu0 %v10271_v27  ;;  %1089 = vmatmul.mubr.f32.vlgmr.msra.gmra.mrb[2].mxu1 %v9633_v30  ;;  %v1987_v14 = vsub.f32 %v8007_v51, %v8007_v51 }
  0x96   :  { %vm10372_vm8 = vmpackc.low %vm181_vm4, %vm173_vm13  ;;  %v8015_v9 = vsel %vm181_vm4, 1.0, %v11491_v58  ;;  %8520 = vmatpush1.bf16.msk.msra.mxu1 %vm9886_vm0, %v11476_v7  ;;  %1167 = vmatprep.mubr.f32.mxu1 %v11491_v58  ;;  %vm11528_vm13 = vcmp.ge.s32.totalorder %v94_v44, %v9548_v11  ;;  %v1982_v0 = vand.u32 4294901760, %v10365_v6  ;;  %v1994_v8 = vand.u32 4294901760, %v10367_v10 }
  0x97   :  { %vm190_vm9 = vmand %vm11528_vm13, %vm158_vm7  ;;  %v1999_v31 = vsub.f32 %v8015_v9, %v8015_v9  ;;  %v10393_v35 = vpack.c.bf16 %v10367_v10, %v10365_v6  ;;  %8522 = vmatprep.subr.msk.bf16.mxu1 %vm9917_vm12, %v11476_v7  ;;  %vm11530_vm4 = vcmp.ge.s32.totalorder %v94_v44, %v9551_v12  ;;  %vm129_vm7 = vcmp.ge.s32.totalorder %v10259_v37, %v9551_v12  ;;  %v11598_v62 = vld [vmem:[#allocation40_spill] sm:$0xff] }
  0x98   :  { %vm198_vm14 = vmand %vm11530_vm4, %vm166_vm15  ;;  %vm165_vm13 = vcmp.lt.s32.totalorder %v10259_v37, %v9587_v20  ;;  %v1988_v57 = vand.u32 4294901760, %v1987_v14  ;;  %v8024_v61 = vsel %vm190_vm9, 1.0, %v11491_v58  ;;  %8564 = vmatpush1.bf16.msra.mxu0 %v10281_v50  ;;  %v1983_v13 = vsub.f32 %v10365_v6, %v1982_v0 }
  0x99   :  { %11529 = vst [vmem:[#allocation48_spill] sm:$0xff] %v10393_v35  ;;  %vm10408_vm11 = vmpackc.low %vm198_vm14, %vm190_vm9  ;;  %v1995_v44 = vsub.f32 %v10367_v10, %v1994_v8  ;;  %v2000_v4 = vand.u32 4294901760, %v1999_v31  ;;  %v8032_v53 = vsel %vm198_vm14, 1.0, %v11491_v58  ;;  %8566 = vmatprep.subr.msk.bf16.mxu0 %vm9845_vm1, %v11476_v7  ;;  %vm11533_vm15 = vcmp.lt.s32.totalorder %v10259_v37, %v9570_v17 }
  0x9a   :  { %vm11534_vm9 = vcmp.ge.s32.totalorder %v10259_v37, %v9548_v11  ;;  %v1989_v51 = vsub.f32 %v1987_v14, %v1988_v57  ;;  %v2005_v9 = vsub.f32 %v8024_v61, %v8024_v61  ;;  %v2017_v50 = vsub.f32 %v8032_v53, %v8032_v53  ;;  %8524 = vmatpush1.bf16.msk.msra.mxu1 %vm10032_vm3, %v11476_v7  ;;  %vm197_vm14 = vmand %vm129_vm7, %vm165_vm13 }
  0x9b   :  { %vm189_vm4 = vmand %vm11534_vm9, %vm11533_vm15  ;;  %v10424_v6 = vpack.c.bf16 %v1999_v31, %v1987_v14  ;;  %v1984_v17 = vand.u32 4294901760, %v1983_v13  ;;  %v1996_v10 = vand.u32 4294901760, %v1995_v44  ;;  %v2001_v11 = vsub.f32 %v1999_v31, %v2000_v4  ;;  %1632 = vmatmul.mubr.f32.vlgmr.msra.gmra.mrb[2].mxu0 %v9633_v30  ;;  %8526 = vmatprep.subr.bf16.mxu1 %v10287_v38 }
  0x9c   :  { %v8023_v27 = vsel %vm189_vm4, 1.0, %v11491_v58  ;;  %vm10438_vm15 = vmpackc.low %vm197_vm14, %vm189_vm4  ;;  %v11536_v14 = vmov 0  ;;  %v1990_v61 = vand.u32 4294901760, %v1989_v51  ;;  %v2006_v53 = vand.u32 4294901760, %v2005_v9  ;;  %8568 = vmatpush1.bf16.msk.msra.mxu0 %vm9978_vm6, %v11476_v7  ;;  %1710 = vmatprep.mubr.f32.mxu0 %v11491_v58 }
  0x9d   :  { %11535 = vst [vmem:[#allocation49_spill] sm:$0xff] %v10424_v6  ;;  %v11537_v14 = vsel %vm10438_vm15, 4294967295, %v11536_v14  ;;  %v2018_v20 = vand.u32 4294901760, %v2017_v50  ;;  %v8031_v32 = vsel %vm197_vm14, 1.0, %v11491_v58  ;;  %v10447_v12 = vpack.c.bf16 %v1996_v10, %v1984_v17  ;;  %8570 = vmatprep.subr.msk.bf16.mxu0 %vm10092_vm5, %v11476_v7  ;;  %1171 = vmatmul.mubr.f32.vlgmr.msra.gmra.mrb[2].mxu1 %v9657_v36 }
  0x9e   :  { %11538 = vst [vmem:[#allocation50_spill] sm:$0xff] %v11537_v14  ;;  %v2002_v37 = vand.u32 4294901760, %v2001_v11  ;;  %v2011_v31 = vsub.f32 %v8023_v27, %v8023_v27  ;;  %v2023_v13 = vsub.f32 %v8031_v32, %v8031_v32  ;;  %v2007_v44 = vsub.f32 %v2005_v9, %v2006_v53  ;;  %8528 = vmatpush1.bf16.msra.mxu1 %v10302_v33 }
  0x9f   :  { %11539 = vst [vmem:[#allocation51_spill] sm:$0xff] %v10447_v12  ;;  %v2019_v51 = vsub.f32 %v2017_v50, %v2018_v20  ;;  %v10453_v38 = vpack.c.bf16 %v2017_v50, %v2005_v9  ;;  %1265 = vmatprep.mubr.f32.mxu1 %v11491_v58  ;;  %8530 = vmatprep.subr.bf16.mxu1 %v10319_v39  ;;  %vm11545_vm7 = vnez %v11487_v43  ;;  %v11548_v39 = vand.u32 4294901760, %v10178_v45 }
  0xa0   :  { %v10457_v34 = vpack.c.bf16 %v2002_v37, %v1990_v61  ;;  %v2012_v17 = vand.u32 4294901760, %v2011_v31  ;;  %v2024_v10 = vand.u32 4294901760, %v2023_v13  ;;  %v10459_v27 = vpack.c.bf16 %v2023_v13, %v2011_v31  ;;  %8572 = vmatpush1.bf16.msk.msra.mxu0 %vm11545_vm7, %v11476_v7 }
  0xa1   :  { %11540 = vst [vmem:[#allocation52_spill] sm:$0xff] %v10453_v38  ;;  %v2008_v32 = vand.u32 4294901760, %v2007_v44  ;;  %v2020_v11 = vand.u32 4294901760, %v2019_v51  ;;  %v10462_v48 = vpack.c.bf16 %v1994_v8, %v1982_v0  ;;  %v10464_v28 = vpack.c.bf16 %v2000_v4, %v1988_v57  ;;  %8574 = vmatprep.subr.bf16.mxu0 %v10308_v3 }
  0xa2   :  { %11541 = vst [vmem:[#allocation53_spill] sm:$0xff] %v10457_v34  ;;  %11542 = vst [vmem:[#allocation54_spill] sm:$0xff] %v10459_v27  ;;  %v2013_v50 = vsub.f32 %v2011_v31, %v2012_v17  ;;  %v2025_v9 = vsub.f32 %v2023_v13, %v2024_v10  ;;  %v10469_v61 = vpack.c.bf16 %v2018_v20, %v2006_v53  ;;  %v11549_v44 = vand.u32 4294901760, %v10180_v47 }
  0xa3   :  { %11543 = vst [vmem:[#allocation55_spill] sm:$0xff] %v10462_v48  ;;  %11544 = vst [vmem:[#allocation56_spill] sm:$0xff] %v10464_v28  ;;  %v10471_v37 = vpack.c.bf16 %v2024_v10, %v2012_v17  ;;  %v10480_v8 = vpack.c.bf16 %v2020_v11, %v2008_v32  ;;  %8532 = vmatpush1.bf16.msra.mxu1 %v10331_v52  ;;  %1714 = vmatmul.mubr.f32.vlgmr.msra.gmra.mrb[2].mxu0 %v9657_v36  ;;  %v11552_v45 = vand.u32 4294901760, %v10204_v24  ;;  %v9205_v24 = vld [vmem:[#allocation5] ss:$18 sps:$4 sm:$0xff]  }
  0xa4   :  { %11546 = vst [vmem:[#allocation57_spill] sm:$0xff] %v10469_v61  ;;  %v10478_v0 = vpack.c.bf16 %v11549_v44, %v11548_v39  ;;  %v2014_v57 = vand.u32 4294901760, %v2013_v50  ;;  %v2026_v4 = vand.u32 4294901760, %v2025_v9  ;;  %8534 = vmatprep.subr.msk.bf16.mxu1 %vm9823_vm10, %v11476_v7  ;;  %8576 = vmatpush1.bf16.msra.mxu0 %v10325_v5  ;;  %v11553_v47 = vand.u32 4294901760, %v10215_v25  ;;  %v9207_v25 = vld [vmem:[#allocation5 + $0x24] ss:$18 sps:$4 sm:$0xff]  }
  0xa5   :  { %11547 = vst [vmem:[#allocation58_spill] sm:$0xff] %v10471_v37  ;;  %11551 = vst [vmem:[#allocation60_spill] sm:$0xff] %v10480_v8  ;;  %1808 = vmatprep.mubr.f32.mxu0 %v11491_v58  ;;  %vm11556_vm13 = vnez %v11396_v22  ;;  %vm11557_vm9 = vnez %v11398_v29  ;;  %vm11558_vm4 = vnez %v11400_v40  ;;  %vm11559_vm14 = vnez %v11406_v54  ;;  %v11590_v22 = vld [vmem:[#allocation50_spill] sm:$0xff]  ;;  %v11592_v29 = vld [vmem:[#allocation32_spill] sm:$0xff] }
  0xa6   :  { %11550 = vst [vmem:[#allocation59_spill] sm:$0xff] %v10478_v0  ;;  %v10492_v39 = vpack.c.bf16 %v11553_v47, %v11552_v45  ;;  %v10495_v53 = vpack.c.bf16 %v2026_v4, %v2014_v57  ;;  %8578 = vmatprep.subr.bf16.mxu0 %v10478_v0  ;;  %1267 = vmatmul.mubr.f32.vlgmr.msra.gmra.mrb[2].mxu1 %v9604_v23  ;;  %v9209_v45 = vld [vmem:[#allocation5 + $0x4] ss:$18 sps:$4 sm:$0xff]   ;;  %v9210_v47 = vld [vmem:[#allocation5 + $0x28] ss:$18 sps:$4 sm:$0xff]  }
  0xa7   :  { %8536 = vmatpush1.bf16.msk.msra.mxu1 %vm9886_vm0, %v11476_v7  ;;  %1345 = vmatprep.mubr.f32.mxu1 %v11491_v58  ;;  %v11593_v40 = vld [vmem:[#allocation51_spill] sm:$0xff]  ;;  %v11594_v54 = vld [vmem:[#allocation33_spill] sm:$0xff] }
  0xa8   :  { %11554 = vst [vmem:[#allocation61_spill] sm:$0xff] %v10492_v39  ;;  %11555 = vst [vmem:[#allocation62_spill] sm:$0xff] %v10495_v53  ;;  %8538 = vmatprep.subr.msk.bf16.mxu1 %vm9917_vm12, %v11476_v7  ;;  %8580 = vmatpush1.bf16.msra.mxu0 %v10492_v39 }
  0xa9   :  { %8582 = vmatprep.subr.msk.bf16.mxu0 %vm9845_vm1, %v11476_v7 }
  0xab   :  { %8540 = vmatpush1.bf16.msk.msra.mxu1 %vm10032_vm3, %v11476_v7  ;;  %1810 = vmatmul.mubr.f32.vlgmr.msra.gmra.mrb[2].mxu0 %v9604_v23 }
  0xac   :  { %8590 = vmatprep.subr.msk.bf16.mxu1 %vm10335_vm2, %v11476_v7  ;;  %8584 = vmatpush1.bf16.msk.msra.mxu0 %vm9978_vm6, %v11476_v7  ;;  %v11597_v56 = vld [vmem:[#allocation60_spill] sm:$0xff] }
  0xad   :  { %1888 = vmatprep.mubr.f32.mxu0 %v11491_v58  ;;  %8586 = vmatprep.subr.msk.bf16.mxu0 %vm10092_vm5, %v11476_v7 }
  0xae   :  { %1347 = vmatmul.mubr.f32.vlgmr.msra.gmra.mrb[2].mxu1 %v9604_v23 }
  0xaf   :  { %8592 = vmatpush1.bf16.msk.msra.mxu1 %vm10372_vm8, %v11476_v7  ;;  %1968 = vmatprep.mubr.f32.mxu1 %v11491_v58  ;;  %v11599_v15 = vld [vmem:[#allocation62_spill] sm:$0xff] }
  0xb0   :  { %8594 = vmatprep.subr.msk.bf16.mxu1 %vm10408_vm11, %v11476_v7  ;;  %8588 = vmatpush1.bf16.msk.msra.mxu0 %vm11545_vm7, %v11476_v7 }
  0xb1   :  { %8638 = vmatprep.subr.msk.bf16.mxu0 %vm11556_vm13, %v11476_v7 }
  0xb3   :  { %8596 = vmatpush1.bf16.msk.msra.mxu1 %vm10438_vm15, %v11476_v7  ;;  %1890 = vmatmul.mubr.f32.vlgmr.msra.gmra.mrb[2].mxu0 %v9604_v23 }
  0xb4   :  { %8598 = vmatprep.subr.bf16.mxu1 %v10447_v12  ;;  %8640 = vmatpush1.bf16.msk.msra.mxu0 %vm11557_vm9, %v11476_v7 }
  0xb5   :  { %2709 = vmatprep.mubr.f32.mxu0 %v11491_v58  ;;  %8642 = vmatprep.subr.msk.bf16.mxu0 %vm11558_vm4, %v11476_v7 }
  0xb6   :  { %1974 = vmatmul.mubr.f32.vlgmr.msra.gmra.mrb[4].mxu1 %v9708_v55 }
  0xb7   :  { %8600 = vmatpush1.bf16.msra.mxu1 %v10457_v34  ;;  %2084 = vmatprep.mubr.f32.mxu1 %v11491_v58 }
  0xb8   :  { %8602 = vmatprep.subr.bf16.mxu1 %v10480_v8  ;;  %8644 = vmatpush1.bf16.msk.msra.mxu0 %vm11559_vm14, %v11476_v7 }
  0xb9   :  { %8646 = vmatprep.subr.bf16.mxu0 %v9720_v63 }
  0xbb   :  { %8604 = vmatpush1.bf16.msra.mxu1 %v10495_v53 }
  0xbc   :  { %8606 = vmatprep.subr.bf16.mxu1 %v10393_v35 }
  0xbe   :  { %2086 = vmatmul.mubr.f32.vlgmr.msra.gmra.mrb[4].mxu1 %v9604_v23 }
  0xbf   :  { %8608 = vmatpush1.bf16.msra.mxu1 %v10424_v6  ;;  %2172 = vmatprep.mubr.f32.mxu1 %v11491_v58 }
  0xc0   :  { %8610 = vmatprep.subr.bf16.mxu1 %v10453_v38 }
  0xc3   :  { %8612 = vmatpush1.bf16.msra.mxu1 %v10459_v27 }
  0xc4   :  { %8614 = vmatprep.subr.msk.bf16.mxu1 %vm10335_vm2, %v11476_v7 }
  0xc6   :  { %2175 = vmatmul.mubr.f32.vlgmr.msra.gmra.mrb[4].mxu1 %v9633_v30  ;;  %v9421_v30 = vmov 1983009808  }
  0xc7   :  { %8616 = vmatpush1.bf16.msk.msra.mxu1 %vm10372_vm8, %v11476_v7  ;;  %2253 = vmatprep.mubr.f32.mxu1 %v11491_v58 }
  0xc8   :  { %8618 = vmatprep.subr.msk.bf16.mxu1 %vm10408_vm11, %v11476_v7 }
  0xcb   :  { %8620 = vmatpush1.bf16.msk.msra.mxu1 %vm10438_vm15, %v11476_v7 }
  0xcc   :  { %8622 = vmatprep.subr.bf16.mxu1 %v10462_v48 }
  0xce   :  { %2257 = vmatmul.mubr.f32.vlgmr.msra.gmra.mrb[4].mxu1 %v9657_v36  ;;  %v2460_v36 = vunpack.c.l.s4 %v9421_v30 }
  0xcf   :  { %8624 = vmatpush1.bf16.msra.mxu1 %v10464_v28  ;;  %2351 = vmatprep.mubr.f32.mxu1 %v11491_v58 }
  0xd0   :  { %8626 = vmatprep.subr.bf16.mxu1 %v10469_v61  ;;  %v2461_v55 = vunpack.c.0.s8 %v2460_v36 }
  0xd3   :  { %8628 = vmatpush1.bf16.msra.mxu1 %v10471_v37  ;;  %v9215_v37 = vld [vmem:[#allocation5 + $0xc] ss:$18 sps:$4 sm:$0xff]  }
  0xd4   :  { %8630 = vmatprep.subr.msk.bf16.mxu1 %vm10335_vm2, %v11476_v7 }
  0xd6   :  { %2353 = vmatmul.mubr.f32.vlgmr.msra.gmra.mrb[4].mxu1 %v9604_v23 }
  0xd7   :  { %8632 = vmatpush1.bf16.msk.msra.mxu1 %vm10372_vm8, %v11476_v7  ;;  %2431 = vmatprep.mubr.f32.mxu1 %v11491_v58 }
  0xd8   :  { %8634 = vmatprep.subr.msk.bf16.mxu1 %vm10408_vm11, %v11476_v7 }
  0xdb   :  { %8636 = vmatpush1.bf16.msk.msra.mxu1 %vm10438_vm15, %v11476_v7  ;;  %vm11560_vm15 = vcmask 261120  }
  0xdc   :  { %8686 = vmatprep.subr.msk.bf16.mxu1 %vm9823_vm10, %v11476_v7 }
  0xde   :  { %2433 = vmatmul.mubr.f32.vlgmr.msra.gmra.mrb[4].mxu1 %v9604_v23  ;;  %v10615_v23 = vsub.s32 %v2461_v55, %v9519_v1  ;;  %v9211_v55 = vld [vmem:[#allocation5 + $0x8] ss:$18 sps:$4 sm:$0xff]  }
  0xdf   :  { %8688 = vmatpush1.bf16.msk.msra.mxu1 %vm9886_vm0, %v11476_v7  ;;  %3252 = vmatprep.mubr.f32.mxu1 %v11491_v58 }
  0xe0   :  { %8690 = vmatprep.subr.msk.bf16.mxu1 %vm9917_vm12, %v11476_v7  ;;  %v2465_v20 = vrot.slane %v9205_v24, %v10615_v23  ;;  %v2479_v31 = vrot.slane %v9207_v25, %v10615_v23  ;;  %v2472_v30 = vrot.slane %v9209_v45, %v10615_v23  ;;  %v2486_v36 = vrot.slane %v9210_v47, %v10615_v23  ;;  %v9213_v24 = vld [vmem:[#allocation5 + $0x2c] ss:$18 sps:$4 sm:$0xff]  }
  0xe1   :  { %v7205_v41 = vrot.slane %v9229_v59, %v10615_v23  ;;  %v7219_v2 = vrot.slane %v9231_v46, %v10615_v23  ;;  %v7226_v43 = vrot.slane %v9234_v26, %v10615_v23 }
  0xe2   :  { %v2487_v17 = vcombine.low %v2465_v20, %v2479_v31  ;;  %v2488_v32 = vcombine.high %v2465_v20, %v2479_v31  ;;  %v2489_v25 = vcombine.low %v2472_v30, %v2486_v36  ;;  %v2490_v1 = vcombine.high %v2472_v30, %v2486_v36  ;;  %v9216_v30 = vld [vmem:[#allocation5 + $0x30] ss:$18 sps:$4 sm:$0xff]  }
  0xe3   :  { %8692 = vmatpush1.bf16.msk.msra.mxu1 %vm10032_vm3, %v11476_v7  ;;  %v2515_v20 = vrot.slane %v9213_v24, %v10615_v23  ;;  %v2508_v36 = vrot.slane %v9215_v37, %v10615_v23  ;;  %v77_v37 = vld [vmem:[#allocation5 + $0x10] sm:$0x3] }
  0xe4   :  { %8694 = vmatprep.subr.bf16.mxu1 %v10059_v19  ;;  %v2501_v19 = vrot.slane %v9211_v55, %v10615_v23  ;;  %v2522_v55 = vrot.slane %v9216_v30, %v10615_v23 }
  0xe6   :  { %v2525_v24 = vcombine.low %v2508_v36, %v2522_v55 }
 0x14c   :  { %v805_v13 = vpop.f32.mrb[0].mxu0 }
 0x14d   :  { %v807_v51 = vpop.f32.mrb[1].mxu0 }
 0x14f   :  { %v547_v10 = vpop.f32.mrb[0].mxu1 }
 0x150   :  { %v9057_v11 = vadd.f32 %v805_v13, %v547_v10  ;;  %v549_v50 = vpop.f32.mrb[1].mxu1 }
 0x151   :  { %v9058_v9 = vadd.f32 %v807_v51, %v549_v50  ;;  %v2524_v50 = vcombine.high %v2501_v19, %v2515_v20 }
 0x152   :  { %v2535_v44 = vmul.f32 %v9057_v11, %v2487_v17 }
 0x153   :  { %v2536_v57 = vmul.f32 %v9058_v9, %v2488_v32  ;;  %v2523_v32 = vcombine.low %v2501_v19, %v2515_v20 }
 0x155   :  { %v2543_v4 = vadd.f32 %v2536_v57, %v2535_v44 }
 0x181   :  { %v1348_v31 = vpop.f32.mrb[2].mxu1 }
 0x182   :  { %v2537_v13 = vmul.f32 %v2489_v25, %v1348_v31  ;;  %v1350_v51 = vpop.f32.mrb[3].mxu1  ;;  %v2526_v25 = vcombine.high %v2508_v36, %v2522_v55 }
 0x183   :  { %v2538_v17 = vmul.f32 %v2490_v1, %v1350_v51 }
 0x184   :  { %v2544_v10 = vadd.f32 %v2543_v4, %v2537_v13 }
 0x186   :  { %v2545_v11 = vadd.f32 %v2544_v10, %v2538_v17  ;;  %v1891_v9 = vpop.f32.mrb[2].mxu0 }
 0x187   :  { %v2539_v44 = vmul.f32 %v2523_v32, %v1891_v9  ;;  %v1893_v57 = vpop.f32.mrb[3].mxu0  ;;  %v78_v9 = vld [vmem:[#allocation5 + $0x22] sm:$0x3] }
 0x188   :  { %v2540_v47 = vmul.f32 %v2524_v50, %v1893_v57 }
 0x189   :  { %v2546_v45 = vadd.f32 %v2545_v11, %v2539_v44  ;;  %v79_v44 = vld [vmem:[#allocation5 + $0x34] sm:$0x3] }
 0x18b   :  { %v2547_v63 = vadd.f32 %v2546_v45, %v2540_v47  ;;  %v80_v47 = vld [vmem:[#allocation5 + $0x46] sm:$0x3] }
 0x1b1   :  { %v2434_v31 = vpop.f32.mrb[4].mxu1 }
 0x1b2   :  { %v2541_v1 = vmul.f32 %v2525_v24, %v2434_v31  ;;  %v2436_v4 = vpop.f32.mrb[5].mxu1 }
 0x1b3   :  { %v2542_v13 = vmul.f32 %v2526_v25, %v2436_v4 }
 0x1b4   :  { %v2548_v51 = vadd.f32 %v2547_v63, %v2541_v1 }
 0x1b6   :  { %v2549_v19 = vadd.f32 %v2548_v51, %v2542_v13 }
 0x1b8   :  { %2550 = vrot.lane.b32.xlu0 %v2549_v19, %s9422_s3 }
 0x22a   :  { %v2551_v20 = vpop.permute.xlu0 %2550 }
 0x22b   :  { %v2552_v17 = vadd.f32 %v2551_v20, %v2549_v19 }
 0x22d   :  { %2553 = vrot.lane.b32.xlu0 %v2552_v17, %s9412_s29 }
 0x29f   :  { %v2554_v10 = vpop.permute.xlu0 %2553 }
 0x2a0   :  { %v2555_v32 = vadd.f32 %v2554_v10, %v2552_v17 }
 0x2a2   :  { %v2557_v11 = vcombine.high %v2555_v32, %v2555_v32  ;;  %v2564_v50 = vrot.slane %v2555_v32, %v10615_v23 }
 0x2a4   :  { %v2571_v57 = vrot.slane %v2557_v11, %v10615_v23  ;;  %v2572_v45 = vcombine.high %v2564_v50, %v2564_v50  ;;  %v2578_v63 = vadd.f32 %v2564_v50, %v77_v37 }
 0x2a6   :  { %v2573_v30 = vcombine.high %v2571_v57, %v2571_v57  ;;  %v2579_v36 = vadd.f32 %v2572_v45, %v78_v9  ;;  %v2580_v55 = vadd.f32 %v2571_v57, %v79_v44  ;;  %v8129_v24 = vmul.f32 -1.442695, %v2578_v63 }
 0x2a8   :  { %v2581_v25 = vadd.f32 %v2573_v30, %v80_v47  ;;  %9243 = vpow2.f32 %v8129_v24  ;;  %v8130_v31 = vmul.f32 -1.442695, %v2579_v36  ;;  %v8131_v1 = vmul.f32 -1.442695, %v2580_v55 }
 0x2aa   :  { %9245 = vpow2.f32 %v8130_v31  ;;  %v8132_v4 = vmul.f32 -1.442695, %v2581_v25 }
 0x2ab   :  { %9247 = vpow2.f32 %v8131_v1 }
 0x2ac   :  { %9249 = vpow2.f32 %v8132_v4 }
 0x2b2   :  { %v9244_v13 = vpop.eup %9243 }
 0x2b3   :  { %v2594_v51 = vadd.f32 1.0, %v9244_v13 }
 0x2b4   :  { %v9246_v19 = vpop.eup %9245 }
 0x2b5   :  { %v9248_v20 = vpop.eup %9247  ;;  %v2595_v17 = vadd.f32 1.0, %v9246_v19  ;;  %9251 = vrcp.f32 %v2594_v51 }
 0x2b6   :  { %v9250_v10 = vpop.eup %9249  ;;  %v2596_v32 = vadd.f32 1.0, %v9248_v20 }
 0x2b7   :  { %v2597_v37 = vadd.f32 1.0, %v9250_v10  ;;  %9253 = vrcp.f32 %v2595_v17  ;;  %v11562_v17 = vld [vmem:[#allocation30_spill] sm:$0xff]  ;;  %v11563_v10 = vld [vmem:[#allocation23_spill] sm:$0xff] }
 0x2b8   :  { %9255 = vrcp.f32 %v2596_v32  ;;  %v11564_v32 = vld [vmem:[#allocation34_spill] sm:$0xff] }
 0x2b9   :  { %9257 = vrcp.f32 %v2597_v37  ;;  %v11565_v37 = vld [vmem:[#allocation24_spill] sm:$0xff] }
 0x2bf   :  { %v9252_v11 = vpop.eup %9251 }
 0x2c0   :  { %v2606_v44 = vmul.f32 %v9252_v11, %v2578_v63  ;;  %v11566_v11 = vld [vmem:[#allocation36_spill] sm:$0xff] }
 0x2c1   :  { %v9254_v50 = vpop.eup %9253 }
 0x2c2   :  { %v9256_v9 = vpop.eup %9255  ;;  %v2607_v57 = vmul.f32 %v9254_v50, %v2579_v36  ;;  %v11567_v50 = vld [vmem:[#allocation26_spill] sm:$0xff] }
 0x2c3   :  { %v9258_v45 = vpop.eup %9257  ;;  %v2608_v47 = vmul.f32 %v9256_v9, %v2580_v55  ;;  %v11568_v9 = vld [vmem:[#allocation37_spill] sm:$0xff] }
 0x2c4   :  { %v2609_v30 = vmul.f32 %v9258_v45, %v2581_v25  ;;  %v2618_v24 = vcombine.low %v2606_v44, %v2607_v57  ;;  %v11561_v25 = vld [vmem:[#allocation29_spill] sm:$0xff]  ;;  %v11569_v44 = vld [vmem:[#allocation27_spill] sm:$0xff]  ;;  %v11571_v45 = vld [vmem:[#allocation20_spill] sm:$0xff] }
 0x2c5   :  { %v11570_v57 = vld [vmem:[#allocation41_spill] sm:$0xff] }
 0x2c6   :  { %v2619_v31 = vcombine.low %v2608_v47, %v2609_v30  ;;  %v2626_v1 = vrot.slane %v2618_v24, %v10615_v23  ;;  %v11572_v47 = vld [vmem:[#allocation44_spill] sm:$0xff]  ;;  %v11573_v30 = vld [vmem:[#allocation21_spill] sm:$0xff] }
 0x2c7   :  { %v11574_v24 = vld [vmem:[#allocation25_spill] sm:$0xff] }
 0x2c8   :  { %v2633_v4 = vrot.slane %v2619_v31, %v10615_v23  ;;  %v11575_v31 = vld [vmem:[#allocation46_spill] sm:$0xff] }
 0x2ca   :  { %v2634_v13 = vcombine.low %v2626_v1, %v2633_v4  ;;  %v11576_v1 = vld [vmem:[#allocation28_spill] sm:$0xff] }
 0x2cb   :  { %v11578_v4 = vld [vmem:[#allocation32_spill] sm:$0xff] }
 0x2cc   :  { %v2635_v51 = vsel %vm11560_vm15, %v2634_v13, 0  ;;  %vm11577_vm15 = vnez %v11537_v14  ;;  %v11579_v13 = vld [vmem:[#allocation33_spill] sm:$0xff] }
 0x2cd   :  { %v10632_v19 = vand.u32 4294901760, %v2635_v51 }
 0x2cf   :  { %v10635_v20 = vsub.f32 %v2635_v51, %v10632_v19  ;;  %v11580_v51 = vld [vmem:[#allocation35_spill] sm:$0xff] }
 0x2d1   :  { %v10638_v63 = vand.u32 4294901760, %v10635_v20 }
 0x2d3   :  { %v2713_v36 = vsub.f32 %v10635_v20, %v10638_v63 }
 0x2d5   :  { %v10642_v55 = vand.u32 4294901760, %v2713_v36  ;;  %v11581_v36 = vld [vmem:[#allocation40_spill] sm:$0xff] }
 0x2d7   :  { %2715 = vmatmul.mubr.f32.vlgmr.msra.gmra.mrb[4].mxu0 %v10642_v55  ;;  %3258 = vmatmul.mubr.f32.vlgmr.msra.gmra.mrb[6].mxu1 %v10642_v55 }
 0x2d8   :  { %8648 = vmatpush1.bf16.msra.mxu0 %v9723_v16  ;;  %8696 = vmatpush1.bf16.msra.mxu1 %v10174_v60 }
 0x2d9   :  { %8650 = vmatprep.subr.bf16.mxu0 %v11561_v25  ;;  %8698 = vmatprep.subr.bf16.mxu1 %v10183_v42 }
 0x2da   :  { %2825 = vmatprep.mubr.f32.mxu0 %v11491_v58  ;;  %3368 = vmatprep.mubr.f32.mxu1 %v11491_v58 }
 0x2dc   :  { %8652 = vmatpush1.bf16.msra.mxu0 %v11562_v17  ;;  %8700 = vmatpush1.bf16.msra.mxu1 %v10225_v21 }
 0x2dd   :  { %8654 = vmatprep.subr.bf16.mxu0 %v11563_v10  ;;  %8702 = vmatprep.subr.bf16.mxu1 %v11564_v32 }
 0x2df   :  { %2827 = vmatmul.mubr.f32.vlgmr.msra.gmra.mrb[4].mxu0 %v10632_v19  ;;  %3370 = vmatmul.mubr.f32.vlgmr.msra.gmra.mrb[6].mxu1 %v10632_v19 }
 0x2e0   :  { %8656 = vmatpush1.bf16.msra.mxu0 %v11565_v37  ;;  %8704 = vmatpush1.bf16.msra.mxu1 %v11566_v11 }
 0x2e1   :  { %8658 = vmatprep.subr.bf16.mxu0 %v11567_v50  ;;  %8706 = vmatprep.subr.bf16.mxu1 %v11568_v9 }
 0x2e2   :  { %2913 = vmatprep.mubr.f32.mxu0 %v11491_v58  ;;  %3456 = vmatprep.mubr.f32.mxu1 %v11491_v58 }
 0x2e4   :  { %8660 = vmatpush1.bf16.msra.mxu0 %v11569_v44  ;;  %8708 = vmatpush1.bf16.msra.mxu1 %v11570_v57 }
 0x2e5   :  { %8662 = vmatprep.subr.msk.bf16.mxu0 %vm11556_vm13, %v11476_v7  ;;  %8710 = vmatprep.subr.msk.bf16.mxu1 %vm9823_vm10, %v11476_v7 }
 0x2e7   :  { %2916 = vmatmul.mubr.f32.vlgmr.msra.gmra.mrb[4].mxu0 %v10635_v20  ;;  %3459 = vmatmul.mubr.f32.vlgmr.msra.gmra.mrb[6].mxu1 %v10635_v20 }
 0x2e8   :  { %8664 = vmatpush1.bf16.msk.msra.mxu0 %vm11557_vm9, %v11476_v7  ;;  %8712 = vmatpush1.bf16.msk.msra.mxu1 %vm9886_vm0, %v11476_v7 }
 0x2e9   :  { %8666 = vmatprep.subr.msk.bf16.mxu0 %vm11558_vm4, %v11476_v7  ;;  %8714 = vmatprep.subr.msk.bf16.mxu1 %vm9917_vm12, %v11476_v7 }
 0x2ea   :  { %2994 = vmatprep.mubr.f32.mxu0 %v11491_v58  ;;  %3537 = vmatprep.mubr.f32.mxu1 %v11491_v58 }
 0x2ec   :  { %8668 = vmatpush1.bf16.msk.msra.mxu0 %vm11559_vm14, %v11476_v7  ;;  %8716 = vmatpush1.bf16.msk.msra.mxu1 %vm10032_vm3, %v11476_v7 }
 0x2ed   :  { %8670 = vmatprep.subr.bf16.mxu0 %v11571_v45  ;;  %8718 = vmatprep.subr.bf16.mxu1 %v11572_v47 }
 0x2ef   :  { %2998 = vmatmul.mubr.f32.vlgmr.msra.gmra.mrb[4].mxu0 %v10638_v63  ;;  %3541 = vmatmul.mubr.f32.vlgmr.msra.gmra.mrb[6].mxu1 %v10638_v63 }
 0x2f0   :  { %8672 = vmatpush1.bf16.msra.mxu0 %v11573_v30  ;;  %8720 = vmatpush1.bf16.msra.mxu1 %v10302_v33 }
 0x2f1   :  { %8674 = vmatprep.subr.bf16.mxu0 %v11574_v24  ;;  %8722 = vmatprep.subr.bf16.mxu1 %v11575_v31 }
 0x2f2   :  { %3092 = vmatprep.mubr.f32.mxu0 %v11491_v58  ;;  %3635 = vmatprep.mubr.f32.mxu1 %v11491_v58 }
 0x2f4   :  { %8676 = vmatpush1.bf16.msra.mxu0 %v11576_v1  ;;  %8724 = vmatpush1.bf16.msra.mxu1 %v10331_v52 }
 0x2f5   :  { %8678 = vmatprep.subr.msk.bf16.mxu0 %vm11556_vm13, %v11476_v7  ;;  %8726 = vmatprep.subr.msk.bf16.mxu1 %vm9823_vm10, %v11476_v7 }
 0x2f7   :  { %3094 = vmatmul.mubr.f32.vlgmr.msra.gmra.mrb[4].mxu0 %v10632_v19  ;;  %3637 = vmatmul.mubr.f32.vlgmr.msra.gmra.mrb[6].mxu1 %v10632_v19 }
 0x2f8   :  { %8680 = vmatpush1.bf16.msk.msra.mxu0 %vm11557_vm9, %v11476_v7  ;;  %8728 = vmatpush1.bf16.msk.msra.mxu1 %vm9886_vm0, %v11476_v7 }
 0x2f9   :  { %8682 = vmatprep.subr.msk.bf16.mxu0 %vm11558_vm4, %v11476_v7  ;;  %8730 = vmatprep.subr.msk.bf16.mxu1 %vm9917_vm12, %v11476_v7 }
 0x2fa   :  { %3172 = vmatprep.mubr.f32.mxu0 %v11491_v58  ;;  %3715 = vmatprep.mubr.f32.mxu1 %v11491_v58 }
 0x2fc   :  { %8684 = vmatpush1.bf16.msk.msra.mxu0 %vm11559_vm14, %v11476_v7  ;;  %8732 = vmatpush1.bf16.msk.msra.mxu1 %vm10032_vm3, %v11476_v7 }
 0x2fd   :  { %8734 = vmatprep.subr.msk.bf16.mxu0 %vm9845_vm1, %v11476_v7  ;;  %8782 = vmatprep.subr.msk.bf16.mxu1 %vm10335_vm2, %v11476_v7 }
 0x2ff   :  { %3174 = vmatmul.mubr.f32.vlgmr.msra.gmra.mrb[4].mxu0 %v10632_v19  ;;  %3717 = vmatmul.mubr.f32.vlgmr.msra.gmra.mrb[6].mxu1 %v10632_v19 }
 0x300   :  { %8736 = vmatpush1.bf16.msk.msra.mxu0 %vm9978_vm6, %v11476_v7  ;;  %8784 = vmatpush1.bf16.msk.msra.mxu1 %vm10372_vm8, %v11476_v7 }
 0x301   :  { %8738 = vmatprep.subr.msk.bf16.mxu0 %vm10092_vm5, %v11476_v7  ;;  %8786 = vmatprep.subr.msk.bf16.mxu1 %vm10408_vm11, %v11476_v7 }
 0x302   :  { %3795 = vmatprep.mubr.f32.mxu0 %v11491_v58  ;;  %4338 = vmatprep.mubr.f32.mxu1 %v11491_v58 }
 0x304   :  { %8740 = vmatpush1.bf16.msk.msra.mxu0 %vm11545_vm7, %v11476_v7  ;;  %8788 = vmatpush1.bf16.msk.msra.mxu1 %vm11577_vm15, %v11476_v7 }
 0x305   :  { %8742 = vmatprep.subr.bf16.mxu0 %v11578_v4  ;;  %8790 = vmatprep.subr.bf16.mxu1 %v10447_v12  ;;  %v11582_v12 = vld [vmem:[#allocation38_spill] sm:$0xff]  ;;  %v9225_v4 = vld [vmem:[#allocation7 + $0x2c] ss:$18 sps:$4 sm:$0xff]  }
 0x307   :  { %3801 = vmatmul.mubr.f32.vlgmr.msra.gmra.mrb[6].mxu0 %v10642_v55  ;;  %4344 = vmatmul.mubr.f32.vlgmr.msra.gmra.mrb[8].mxu1 %v10642_v55  ;;  %v11583_v55 = vld [vmem:[#allocation39_spill] sm:$0xff] }
 0x308   :  { %8744 = vmatpush1.bf16.msra.mxu0 %v11579_v13  ;;  %8792 = vmatpush1.bf16.msra.mxu1 %v10457_v34 }
 0x309   :  { %8746 = vmatprep.subr.bf16.mxu0 %v11580_v51  ;;  %8794 = vmatprep.subr.bf16.mxu1 %v10480_v8  ;;  %v11584_v8 = vld [vmem:[#allocation42_spill] sm:$0xff] }
 0x30a   :  { %3911 = vmatprep.mubr.f32.mxu0 %v11491_v58  ;;  %4454 = vmatprep.mubr.f32.mxu1 %v11491_v58 }
 0x30c   :  { %8748 = vmatpush1.bf16.msra.mxu0 %v11581_v36  ;;  %8796 = vmatpush1.bf16.msra.mxu1 %v10495_v53  ;;  %v11585_v53 = vld [vmem:[#allocation43_spill] sm:$0xff] }
 0x30d   :  { %8750 = vmatprep.subr.bf16.mxu0 %v11582_v12  ;;  %8798 = vmatprep.subr.bf16.mxu1 %v10393_v35 }
 0x30f   :  { %3913 = vmatmul.mubr.f32.vlgmr.msra.gmra.mrb[6].mxu0 %v10632_v19  ;;  %4456 = vmatmul.mubr.f32.vlgmr.msra.gmra.mrb[8].mxu1 %v10632_v19 }
 0x310   :  { %8752 = vmatpush1.bf16.msra.mxu0 %v11583_v55  ;;  %8800 = vmatpush1.bf16.msra.mxu1 %v10424_v6 }
 0x311   :  { %8754 = vmatprep.subr.bf16.mxu0 %v11584_v8  ;;  %8802 = vmatprep.subr.bf16.mxu1 %v10453_v38 }
 0x312   :  { %3999 = vmatprep.mubr.f32.mxu0 %v11491_v58  ;;  %4542 = vmatprep.mubr.f32.mxu1 %v11491_v58 }
 0x314   :  { %8756 = vmatpush1.bf16.msra.mxu0 %v11585_v53  ;;  %8804 = vmatpush1.bf16.msra.mxu1 %v10459_v27 }
 0x315   :  { %8758 = vmatprep.subr.msk.bf16.mxu0 %vm9845_vm1, %v11476_v7  ;;  %8806 = vmatprep.subr.msk.bf16.mxu1 %vm10335_vm2, %v11476_v7 }
 0x317   :  { %4002 = vmatmul.mubr.f32.vlgmr.msra.gmra.mrb[6].mxu0 %v10635_v20  ;;  %4545 = vmatmul.mubr.f32.vlgmr.msra.gmra.mrb[8].mxu1 %v10635_v20  ;;  %v11586_v20 = vld [vmem:[#allocation58_spill] sm:$0xff] }
 0x318   :  { %8760 = vmatpush1.bf16.msk.msra.mxu0 %vm9978_vm6, %v11476_v7  ;;  %8808 = vmatpush1.bf16.msk.msra.mxu1 %vm10372_vm8, %v11476_v7 }
 0x319   :  { %8762 = vmatprep.subr.msk.bf16.mxu0 %vm10092_vm5, %v11476_v7  ;;  %8810 = vmatprep.subr.msk.bf16.mxu1 %vm10408_vm11, %v11476_v7 }
 0x31a   :  { %4080 = vmatprep.mubr.f32.mxu0 %v11491_v58  ;;  %4623 = vmatprep.mubr.f32.mxu1 %v11491_v58 }
 0x31c   :  { %8764 = vmatpush1.bf16.msk.msra.mxu0 %vm11545_vm7, %v11476_v7  ;;  %8812 = vmatpush1.bf16.msk.msra.mxu1 %vm11577_vm15, %v11476_v7 }
 0x31d   :  { %8766 = vmatprep.subr.bf16.mxu0 %v10308_v3  ;;  %8814 = vmatprep.subr.bf16.mxu1 %v10462_v48 }
 0x31f   :  { %4084 = vmatmul.mubr.f32.vlgmr.msra.gmra.mrb[6].mxu0 %v10638_v63  ;;  %4627 = vmatmul.mubr.f32.vlgmr.msra.gmra.mrb[8].mxu1 %v10638_v63  ;;  %v11588_v63 = vld [vmem:[#allocation31_spill] sm:$0xff] }
 0x320   :  { %8768 = vmatpush1.bf16.msra.mxu0 %v10325_v5  ;;  %8816 = vmatpush1.bf16.msra.mxu1 %v10464_v28 }
 0x321   :  { %8770 = vmatprep.subr.bf16.mxu0 %v10478_v0  ;;  %8818 = vmatprep.subr.bf16.mxu1 %v10469_v61  ;;  %v9221_v61 = vld [vmem:[#allocation7 + $0x4] ss:$18 sps:$4 sm:$0xff]   ;;  %v9222_v0 = vld [vmem:[#allocation7 + $0x28] ss:$18 sps:$4 sm:$0xff]  }
 0x322   :  { %4178 = vmatprep.mubr.f32.mxu0 %v11491_v58  ;;  %4721 = vmatprep.mubr.f32.mxu1 %v11491_v58  ;;  %v4842_v48 = vrot.slane %v9221_v61, %v10615_v23  ;;  %v4856_v3 = vrot.slane %v9222_v0, %v10615_v23  ;;  %v4885_v0 = vrot.slane %v9225_v4, %v10615_v23 }
 0x324   :  { %8772 = vmatpush1.bf16.msra.mxu0 %v10492_v39  ;;  %8820 = vmatpush1.bf16.msra.mxu1 %v11586_v20  ;;  %v9217_v20 = vld [vmem:[#allocation7] ss:$18 sps:$4 sm:$0xff]   ;;  %v9219_v39 = vld [vmem:[#allocation7 + $0x24] ss:$18 sps:$4 sm:$0xff]   ;;  %v4859_v6 = vcombine.low %v4842_v48, %v4856_v3  ;;  %v4860_v12 = vcombine.high %v4842_v48, %v4856_v3 }
 0x325   :  { %8774 = vmatprep.subr.msk.bf16.mxu0 %vm9845_vm1, %v11476_v7  ;;  %8822 = vmatprep.subr.msk.bf16.mxu1 %vm10335_vm2, %v11476_v7  ;;  %v4835_v28 = vrot.slane %v9217_v20, %v10615_v23  ;;  %v4849_v5 = vrot.slane %v9219_v39, %v10615_v23  ;;  %v9223_v39 = vld [vmem:[#allocation7 + $0x8] ss:$18 sps:$4 sm:$0xff]  }
 0x326   :  { %v4871_v61 = vrot.slane %v9223_v39, %v10615_v23 }
 0x327   :  { %4180 = vmatmul.mubr.f32.vlgmr.msra.gmra.mrb[6].mxu0 %v10632_v19  ;;  %4723 = vmatmul.mubr.f32.vlgmr.msra.gmra.mrb[8].mxu1 %v10632_v19  ;;  %v4857_v27 = vcombine.low %v4835_v28, %v4849_v5  ;;  %v4858_v53 = vcombine.high %v4835_v28, %v4849_v5  ;;  %v9227_v28 = vld [vmem:[#allocation7 + $0xc] ss:$18 sps:$4 sm:$0xff]   ;;  %v9228_v5 = vld [vmem:[#allocation7 + $0x30] ss:$18 sps:$4 sm:$0xff]  }
 0x328   :  { %8776 = vmatpush1.bf16.msk.msra.mxu0 %vm9978_vm6, %v11476_v7  ;;  %8824 = vmatpush1.bf16.msk.msra.mxu1 %vm10372_vm8, %v11476_v7  ;;  %v4893_v14 = vcombine.low %v4871_v61, %v4885_v0 }
 0x329   :  { %8778 = vmatprep.subr.msk.bf16.mxu0 %vm10092_vm5, %v11476_v7  ;;  %8826 = vmatprep.subr.msk.bf16.mxu1 %vm10408_vm11, %v11476_v7 }
 0x32a   :  { %4258 = vmatprep.mubr.f32.mxu0 %v11491_v58  ;;  %4801 = vmatprep.mubr.f32.mxu1 %v11491_v58 }
 0x32c   :  { %8780 = vmatpush1.bf16.msk.msra.mxu0 %vm11545_vm7, %v11476_v7  ;;  %8828 = vmatpush1.bf16.msk.msra.mxu1 %vm11577_vm15, %v11476_v7  ;;  %vm11589_vm15 = vcmask 261120  }
 0x32d   :  { %8830 = vmatprep.subr.msk.bf16.mxu0 %vm11556_vm13, %v11476_v7  ;;  %8878 = vmatprep.subr.msk.bf16.mxu1 %vm9823_vm10, %v11476_v7 }
 0x32f   :  { %4260 = vmatmul.mubr.f32.vlgmr.msra.gmra.mrb[6].mxu0 %v10632_v19  ;;  %4803 = vmatmul.mubr.f32.vlgmr.msra.gmra.mrb[8].mxu1 %v10632_v19  ;;  %v11587_v19 = vld [vmem:[#allocation22_spill] sm:$0xff] }
 0x330   :  { %8832 = vmatpush1.bf16.msk.msra.mxu0 %vm11557_vm9, %v11476_v7  ;;  %8880 = vmatpush1.bf16.msk.msra.mxu1 %vm9886_vm0, %v11476_v7 }
 0x331   :  { %8834 = vmatprep.subr.msk.bf16.mxu0 %vm11558_vm4, %v11476_v7  ;;  %8882 = vmatprep.subr.msk.bf16.mxu1 %vm9917_vm12, %v11476_v7 }
 0x332   :  { %5079 = vmatprep.mubr.f32.mxu0 %v11491_v58  ;;  %5622 = vmatprep.mubr.f32.mxu1 %v11491_v58 }
 0x334   :  { %8836 = vmatpush1.bf16.msk.msra.mxu0 %vm11559_vm14, %v11476_v7  ;;  %8884 = vmatpush1.bf16.msk.msra.mxu1 %vm10032_vm3, %v11476_v7 }
 0x335   :  { %8838 = vmatprep.subr.bf16.mxu0 %v11587_v19  ;;  %8886 = vmatprep.subr.bf16.mxu1 %v11588_v63 }
 0x3d2   :  { %v3175_v38 = vpop.f32.mrb[4].mxu0  ;;  %v3718_v8 = vpop.f32.mrb[6].mxu1 }
 0x3d3   :  { %v4905_v19 = vmul.f32 %v4857_v27, %v3175_v38  ;;  %v3177_v55 = vpop.f32.mrb[5].mxu0  ;;  %v3720_v63 = vpop.f32.mrb[7].mxu1  ;;  %v4907_v36 = vmul.f32 %v4859_v6, %v3718_v8  ;;  %v4878_v38 = vrot.slane %v9227_v28, %v10615_v23  ;;  %v4892_v27 = vrot.slane %v9228_v5, %v10615_v23 }
 0x3d4   :  { %v4906_v35 = vmul.f32 %v4858_v53, %v3177_v55  ;;  %v4908_v34 = vmul.f32 %v4860_v12, %v3720_v63  ;;  %v4894_v53 = vcombine.high %v4871_v61, %v4885_v0 }
 0x3d5   :  { %v4895_v6 = vcombine.low %v4878_v38, %v4892_v27 }
 0x3d6   :  { %v4913_v51 = vadd.f32 %v4906_v35, %v4905_v19 }
 0x3d8   :  { %v4914_v20 = vadd.f32 %v4913_v51, %v4907_v36  ;;  %v4896_v36 = vcombine.high %v4878_v38, %v4892_v27 }
 0x3da   :  { %v4915_v13 = vadd.f32 %v4914_v20, %v4908_v34 }
 0x402   :  { %v4261_v48 = vpop.f32.mrb[6].mxu0  ;;  %v4804_v3 = vpop.f32.mrb[8].mxu1 }
 0x403   :  { %v4909_v35 = vmul.f32 %v4893_v14, %v4261_v48  ;;  %v4263_v12 = vpop.f32.mrb[7].mxu0  ;;  %v4806_v34 = vpop.f32.mrb[9].mxu1  ;;  %v4911_v55 = vmul.f32 %v4895_v6, %v4804_v3  ;;  %v2610_v14 = vld [vmem:[#allocation7 + $0x10] sm:$0x3] }
 0x404   :  { %v4910_v8 = vmul.f32 %v4894_v53, %v4263_v12  ;;  %v4912_v4 = vmul.f32 %v4896_v36, %v4806_v34  ;;  %v2611_v53 = vld [vmem:[#allocation7 + $0x22] sm:$0x3] }
 0x405   :  { %v4916_v51 = vadd.f32 %v4915_v13, %v4909_v35  ;;  %v2612_v13 = vld [vmem:[#allocation7 + $0x34] sm:$0x3]  ;;  %v2613_v35 = vld [vmem:[#allocation7 + $0x46] sm:$0x3] }
 0x407   :  { %v4917_v19 = vadd.f32 %v4916_v51, %v4910_v8 }
 0x409   :  { %v4918_v63 = vadd.f32 %v4917_v19, %v4911_v55 }
 0x40b   :  { %v4919_v20 = vadd.f32 %v4918_v63, %v4912_v4 }
 0x40d   :  { %4920 = vrot.lane.b32.xlu1 %v4919_v20, %s9422_s3 }
 0x47f   :  { %v4921_v39 = vpop.permute.xlu1 %4920 }
 0x480   :  { %v4922_v28 = vadd.f32 %v4921_v39, %v4919_v20 }
 0x482   :  { %4923 = vrot.lane.b32.xlu1 %v4922_v28, %s9412_s29 }
 0x4f4   :  { %v4924_v61 = vpop.permute.xlu1 %4923 }
 0x4f5   :  { %v4925_v0 = vadd.f32 %v4924_v61, %v4922_v28 }
 0x4f7   :  { %v4927_v5 = vcombine.high %v4925_v0, %v4925_v0  ;;  %v4934_v48 = vrot.slane %v4925_v0, %v10615_v23 }
 0x4f9   :  { %v4941_v38 = vrot.slane %v4927_v5, %v10615_v23  ;;  %v4942_v27 = vcombine.high %v4934_v48, %v4934_v48  ;;  %v4948_v3 = vadd.f32 %v4934_v48, %v2610_v14 }
 0x4fb   :  { %v4943_v6 = vcombine.high %v4941_v38, %v4941_v38  ;;  %v4949_v12 = vadd.f32 %v4942_v27, %v2611_v53  ;;  %v4950_v34 = vadd.f32 %v4941_v38, %v2612_v13  ;;  %v8229_v8 = vmul.f32 -1.442695, %v4948_v3 }
 0x4fd   :  { %v4951_v51 = vadd.f32 %v4943_v6, %v2613_v35  ;;  %9259 = vpow2.f32 %v8229_v8  ;;  %v8230_v36 = vmul.f32 -1.442695, %v4949_v12  ;;  %v8231_v55 = vmul.f32 -1.442695, %v4950_v34 }
 0x4ff   :  { %9261 = vpow2.f32 %v8230_v36  ;;  %v8232_v19 = vmul.f32 -1.442695, %v4951_v51 }
 0x500   :  { %9263 = vpow2.f32 %v8231_v55 }
 0x501   :  { %9265 = vpow2.f32 %v8232_v19 }
 0x507   :  { %v9260_v4 = vpop.eup %9259 }
 0x508   :  { %v4964_v63 = vadd.f32 1.0, %v9260_v4 }
 0x509   :  { %v9262_v20 = vpop.eup %9261 }
 0x50a   :  { %v9264_v39 = vpop.eup %9263  ;;  %v4965_v28 = vadd.f32 1.0, %v9262_v20  ;;  %9267 = vrcp.f32 %v4964_v63 }
 0x50b   :  { %v9266_v61 = vpop.eup %9265  ;;  %v4966_v0 = vadd.f32 1.0, %v9264_v39 }
 0x50c   :  { %v4967_v14 = vadd.f32 1.0, %v9266_v61  ;;  %9269 = vrcp.f32 %v4965_v28 }
 0x50d   :  { %9271 = vrcp.f32 %v4966_v0 }
 0x50e   :  { %9273 = vrcp.f32 %v4967_v14 }
 0x514   :  { %v9268_v5 = vpop.eup %9267 }
 0x515   :  { %v4976_v13 = vmul.f32 %v9268_v5, %v4948_v3 }
 0x516   :  { %v9270_v48 = vpop.eup %9269 }
 0x517   :  { %v9272_v53 = vpop.eup %9271  ;;  %v4977_v38 = vmul.f32 %v9270_v48, %v4949_v12 }
 0x518   :  { %v9274_v27 = vpop.eup %9273  ;;  %v4978_v35 = vmul.f32 %v9272_v53, %v4950_v34 }
 0x519   :  { %v4979_v6 = vmul.f32 %v9274_v27, %v4951_v51  ;;  %v4988_v8 = vcombine.low %v4976_v13, %v4977_v38 }
 0x51b   :  { %v4989_v36 = vcombine.low %v4978_v35, %v4979_v6  ;;  %v4996_v55 = vrot.slane %v4988_v8, %v10615_v23  ;;  %v9235_v35 = vld [vmem:[#allocation8 + $0x8] ss:$18 sps:$4 sm:$0xff]   ;;  %v9237_v6 = vld [vmem:[#allocation8 + $0x2c] ss:$18 sps:$4 sm:$0xff]  }
 0x51c   :  { %v7241_v8 = vrot.slane %v9235_v35, %v10615_v23 }
 0x51d   :  { %v5003_v19 = vrot.slane %v4989_v36, %v10615_v23  ;;  %v7255_v36 = vrot.slane %v9237_v6, %v10615_v23 }
 0x51f   :  { %v5004_v4 = vcombine.low %v4996_v55, %v5003_v19  ;;  %v9239_v55 = vld [vmem:[#allocation8 + $0xc] ss:$18 sps:$4 sm:$0xff]   ;;  %v9240_v19 = vld [vmem:[#allocation8 + $0x30] ss:$18 sps:$4 sm:$0xff]  }
 0x521   :  { %v5005_v63 = vsel %vm11589_vm15, %v5004_v4, 0  ;;  %v7263_v4 = vcombine.low %v7241_v8, %v7255_v36 }
 0x522   :  { %v10899_v20 = vand.u32 4294901760, %v5005_v63 }
 0x524   :  { %v10902_v39 = vsub.f32 %v5005_v63, %v10899_v20  ;;  %v7248_v63 = vrot.slane %v9239_v55, %v10615_v23 }
 0x526   :  { %v10905_v3 = vand.u32 4294901760, %v10902_v39 }
 0x528   :  { %v5083_v12 = vsub.f32 %v10902_v39, %v10905_v3 }
 0x52a   :  { %v10909_v34 = vand.u32 4294901760, %v5083_v12 }
 0x52c   :  { %5085 = vmatmul.mubr.f32.vlgmr.msra.gmra.mrb[8].mxu0 %v10909_v34  ;;  %5628 = vmatmul.mubr.f32.vlgmr.msra.gmra.mrb[10].mxu1 %v10909_v34 }
 0x52d   :  { %8840 = vmatpush1.bf16.msra.mxu0 %v9723_v16  ;;  %8888 = vmatpush1.bf16.msra.mxu1 %v10174_v60  ;;  %v11595_v16 = vld [vmem:[#allocation53_spill] sm:$0xff]  ;;  %v11602_v60 = vld [vmem:[#allocation39_spill] sm:$0xff] }
 0x52e   :  { %8842 = vmatprep.subr.bf16.mxu0 %v11561_v25  ;;  %8890 = vmatprep.subr.bf16.mxu1 %v10183_v42  ;;  %v11601_v42 = vld [vmem:[#allocation48_spill] sm:$0xff] }
 0x52f   :  { %5195 = vmatprep.mubr.f32.mxu0 %v11491_v58  ;;  %5738 = vmatprep.mubr.f32.mxu1 %v11491_v58  ;;  %v11605_v25 = vld [vmem:[#allocation52_spill] sm:$0xff] }
 0x531   :  { %8844 = vmatpush1.bf16.msra.mxu0 %v11562_v17  ;;  %8892 = vmatpush1.bf16.msra.mxu1 %v10225_v21  ;;  %v11596_v21 = vld [vmem:[#allocation35_spill] sm:$0xff] }
 0x532   :  { %8846 = vmatprep.subr.bf16.mxu0 %v11563_v10  ;;  %8894 = vmatprep.subr.bf16.mxu1 %v11564_v32  ;;  %v11606_v17 = vld [vmem:[#allocation43_spill] sm:$0xff]  ;;  %v11607_v10 = vld [vmem:[#allocation54_spill] sm:$0xff]  ;;  %v11608_v32 = vld [vmem:[#allocation45_spill] sm:$0xff] }
 0x534   :  { %5197 = vmatmul.mubr.f32.vlgmr.msra.gmra.mrb[8].mxu0 %v10899_v20  ;;  %5740 = vmatmul.mubr.f32.vlgmr.msra.gmra.mrb[10].mxu1 %v10899_v20 }
 0x535   :  { %8848 = vmatpush1.bf16.msra.mxu0 %v11565_v37  ;;  %8896 = vmatpush1.bf16.msra.mxu1 %v11566_v11  ;;  %v11609_v37 = vld [vmem:[#allocation55_spill] sm:$0xff] }
 0x536   :  { %8850 = vmatprep.subr.bf16.mxu0 %v11567_v50  ;;  %8898 = vmatprep.subr.bf16.mxu1 %v11568_v9  ;;  %v11610_v11 = vld [vmem:[#allocation47_spill] sm:$0xff]  ;;  %v11611_v50 = vld [vmem:[#allocation56_spill] sm:$0xff] }
 0x537   :  { %5283 = vmatprep.mubr.f32.mxu0 %v11491_v58  ;;  %5826 = vmatprep.mubr.f32.mxu1 %v11491_v58  ;;  %v11612_v9 = vld [vmem:[#allocation59_spill] sm:$0xff] }
 0x539   :  { %8852 = vmatpush1.bf16.msra.mxu0 %v11569_v44  ;;  %8900 = vmatpush1.bf16.msra.mxu1 %v11570_v57  ;;  %v11613_v44 = vld [vmem:[#allocation57_spill] sm:$0xff] }
 0x53a   :  { %8854 = vmatprep.subr.msk.bf16.mxu0 %vm11556_vm13, %v11476_v7  ;;  %8902 = vmatprep.subr.msk.bf16.mxu1 %vm9823_vm10, %v11476_v7  ;;  %v11614_v57 = vld [vmem:[#allocation61_spill] sm:$0xff] }
 0x53c   :  { %5286 = vmatmul.mubr.f32.vlgmr.msra.gmra.mrb[8].mxu0 %v10902_v39  ;;  %5829 = vmatmul.mubr.f32.vlgmr.msra.gmra.mrb[10].mxu1 %v10902_v39 }
 0x53d   :  { %8856 = vmatpush1.bf16.msk.msra.mxu0 %vm11557_vm9, %v11476_v7  ;;  %8904 = vmatpush1.bf16.msk.msra.mxu1 %vm9886_vm0, %v11476_v7 }
 0x53e   :  { %8858 = vmatprep.subr.msk.bf16.mxu0 %vm11558_vm4, %v11476_v7  ;;  %8906 = vmatprep.subr.msk.bf16.mxu1 %vm9917_vm12, %v11476_v7 }
 0x53f   :  { %5364 = vmatprep.mubr.f32.mxu0 %v11491_v58  ;;  %5907 = vmatprep.mubr.f32.mxu1 %v11491_v58 }
 0x541   :  { %8860 = vmatpush1.bf16.msk.msra.mxu0 %vm11559_vm14, %v11476_v7  ;;  %8908 = vmatpush1.bf16.msk.msra.mxu1 %vm10032_vm3, %v11476_v7 }
 0x542   :  { %8862 = vmatprep.subr.bf16.mxu0 %v11571_v45  ;;  %8910 = vmatprep.subr.bf16.mxu1 %v11572_v47  ;;  %v11615_v45 = vld [vmem:[#allocation58_spill] sm:$0xff]  ;;  %v7212_v47 = vrot.slane %v9233_v49, %v10615_v23 }
 0x544   :  { %5368 = vmatmul.mubr.f32.vlgmr.msra.gmra.mrb[8].mxu0 %v10905_v3  ;;  %5911 = vmatmul.mubr.f32.vlgmr.msra.gmra.mrb[10].mxu1 %v10905_v3  ;;  %v7229_v51 = vcombine.low %v7212_v47, %v7226_v43  ;;  %v7230_v5 = vcombine.high %v7212_v47, %v7226_v43 }
 0x545   :  { %8864 = vmatpush1.bf16.msra.mxu0 %v11573_v30  ;;  %8912 = vmatpush1.bf16.msra.mxu1 %v10302_v33  ;;  %v11603_v33 = vld [vmem:[#allocation49_spill] sm:$0xff]  ;;  %v7227_v30 = vcombine.low %v7205_v41, %v7219_v2 }
 0x546   :  { %8866 = vmatprep.subr.bf16.mxu0 %v11574_v24  ;;  %8914 = vmatprep.subr.bf16.mxu1 %v11575_v31  ;;  %v7228_v24 = vcombine.high %v7205_v41, %v7219_v2 }
 0x547   :  { %5462 = vmatprep.mubr.f32.mxu0 %v11491_v58  ;;  %6005 = vmatprep.mubr.f32.mxu1 %v11491_v58 }
 0x549   :  { %8868 = vmatpush1.bf16.msra.mxu0 %v11576_v1  ;;  %8916 = vmatpush1.bf16.msra.mxu1 %v10331_v52  ;;  %v11604_v52 = vld [vmem:[#allocation42_spill] sm:$0xff] }
 0x54a   :  { %8870 = vmatprep.subr.msk.bf16.mxu0 %vm11556_vm13, %v11476_v7  ;;  %8918 = vmatprep.subr.msk.bf16.mxu1 %vm9823_vm10, %v11476_v7  ;;  %vm11591_vm10 = vnez %v11590_v22 }
 0x54c   :  { %5464 = vmatmul.mubr.f32.vlgmr.msra.gmra.mrb[8].mxu0 %v10899_v20  ;;  %6007 = vmatmul.mubr.f32.vlgmr.msra.gmra.mrb[10].mxu1 %v10899_v20 }
 0x54d   :  { %8872 = vmatpush1.bf16.msk.msra.mxu0 %vm11557_vm9, %v11476_v7  ;;  %8920 = vmatpush1.bf16.msk.msra.mxu1 %vm9886_vm0, %v11476_v7 }
 0x54e   :  { %8874 = vmatprep.subr.msk.bf16.mxu0 %vm11558_vm4, %v11476_v7  ;;  %8922 = vmatprep.subr.msk.bf16.mxu1 %vm9917_vm12, %v11476_v7 }
 0x54f   :  { %5542 = vmatprep.mubr.f32.mxu0 %v11491_v58  ;;  %6085 = vmatprep.mubr.f32.mxu1 %v11491_v58 }
 0x551   :  { %8876 = vmatpush1.bf16.msk.msra.mxu0 %vm11559_vm14, %v11476_v7  ;;  %8924 = vmatpush1.bf16.msk.msra.mxu1 %vm10032_vm3, %v11476_v7 }
 0x552   :  { %8926 = vmatprep.subr.msk.bf16.mxu0 %vm9845_vm1, %v11476_v7  ;;  %8974 = vmatprep.subr.msk.bf16.mxu1 %vm10335_vm2, %v11476_v7 }
 0x554   :  { %5544 = vmatmul.mubr.f32.vlgmr.msra.gmra.mrb[8].mxu0 %v10899_v20  ;;  %6087 = vmatmul.mubr.f32.vlgmr.msra.gmra.mrb[10].mxu1 %v10899_v20 }
 0x555   :  { %8928 = vmatpush1.bf16.msk.msra.mxu0 %vm9978_vm6, %v11476_v7  ;;  %8976 = vmatpush1.bf16.msk.msra.mxu1 %vm10372_vm8, %v11476_v7 }
 0x556   :  { %8930 = vmatprep.subr.msk.bf16.mxu0 %vm10092_vm5, %v11476_v7  ;;  %8978 = vmatprep.subr.msk.bf16.mxu1 %vm10408_vm11, %v11476_v7 }
 0x557   :  { %6165 = vmatprep.mubr.f32.mxu0 %v11491_v58  ;;  %6708 = vmatprep.mubr.f32.mxu1 %v11491_v58 }
 0x559   :  { %8932 = vmatpush1.bf16.msk.msra.mxu0 %vm11545_vm7, %v11476_v7  ;;  %8980 = vmatpush1.bf16.msk.msra.mxu1 %vm11591_vm10, %v11476_v7 }
 0x55a   :  { %8934 = vmatprep.subr.bf16.mxu0 %v11592_v29  ;;  %8982 = vmatprep.subr.bf16.mxu1 %v11593_v40 }
 0x55c   :  { %6171 = vmatmul.mubr.f32.vlgmr.msra.gmra.mrb[10].mxu0 %v10909_v34  ;;  %6714 = vmatmul.mubr.f32.vlgmr.msra.gmra.mrb[12].mxu1 %v10909_v34 }
 0x55d   :  { %8936 = vmatpush1.bf16.msra.mxu0 %v11594_v54  ;;  %8984 = vmatpush1.bf16.msra.mxu1 %v11595_v16 }
 0x55e   :  { %8938 = vmatprep.subr.bf16.mxu0 %v11596_v21  ;;  %8986 = vmatprep.subr.bf16.mxu1 %v11597_v56 }
 0x55f   :  { %6281 = vmatprep.mubr.f32.mxu0 %v11491_v58  ;;  %6824 = vmatprep.mubr.f32.mxu1 %v11491_v58 }
 0x561   :  { %8940 = vmatpush1.bf16.msra.mxu0 %v11598_v62  ;;  %8988 = vmatpush1.bf16.msra.mxu1 %v11599_v15 }
 0x562   :  { %8942 = vmatprep.subr.bf16.mxu0 %v11600_v18  ;;  %8990 = vmatprep.subr.bf16.mxu1 %v11601_v42 }
 0x564   :  { %6283 = vmatmul.mubr.f32.vlgmr.msra.gmra.mrb[10].mxu0 %v10899_v20  ;;  %6826 = vmatmul.mubr.f32.vlgmr.msra.gmra.mrb[12].mxu1 %v10899_v20 }
 0x565   :  { %8944 = vmatpush1.bf16.msra.mxu0 %v11602_v60  ;;  %8992 = vmatpush1.bf16.msra.mxu1 %v11603_v33 }
 0x566   :  { %8946 = vmatprep.subr.bf16.mxu0 %v11604_v52  ;;  %8994 = vmatprep.subr.bf16.mxu1 %v11605_v25  ;;  %v11616_v52 = vld [vmem:[#allocation15_spill] sm:$0xff] }
 0x567   :  { %6369 = vmatprep.mubr.f32.mxu0 %v11491_v58  ;;  %6912 = vmatprep.mubr.f32.mxu1 %v11491_v58  ;;  %v7354_v25 = vmul.u32 4, %v11616_v52 }
 0x569   :  { %8948 = vmatpush1.bf16.msra.mxu0 %v11606_v17  ;;  %8996 = vmatpush1.bf16.msra.mxu1 %v11607_v10  ;;  %v11617_v17 = vld [vmem:[#allocation17_spill] sm:$0xff] }
 0x56a   :  { %8950 = vmatprep.subr.msk.bf16.mxu0 %vm9845_vm1, %v11476_v7  ;;  %8998 = vmatprep.subr.msk.bf16.mxu1 %vm10335_vm2, %v11476_v7  ;;  %v7355_v10 = vmul.u32 4, %v11617_v17 }
 0x56c   :  { %6372 = vmatmul.mubr.f32.vlgmr.msra.gmra.mrb[10].mxu0 %v10902_v39  ;;  %6915 = vmatmul.mubr.f32.vlgmr.msra.gmra.mrb[12].mxu1 %v10902_v39  ;;  %v7264_v39 = vcombine.high %v7241_v8, %v7255_v36 }
 0x56d   :  { %8952 = vmatpush1.bf16.msk.msra.mxu0 %vm9978_vm6, %v11476_v7  ;;  %9000 = vmatpush1.bf16.msk.msra.mxu1 %vm10372_vm8, %v11476_v7 }
 0x56e   :  { %8954 = vmatprep.subr.msk.bf16.mxu0 %vm10092_vm5, %v11476_v7  ;;  %9002 = vmatprep.subr.msk.bf16.mxu1 %vm10408_vm11, %v11476_v7 }
 0x56f   :  { %6450 = vmatprep.mubr.f32.mxu0 %v11491_v58  ;;  %6993 = vmatprep.mubr.f32.mxu1 %v11491_v58 }
 0x571   :  { %8956 = vmatpush1.bf16.msk.msra.mxu0 %vm11545_vm7, %v11476_v7  ;;  %9004 = vmatpush1.bf16.msk.msra.mxu1 %vm11591_vm10, %v11476_v7 }
 0x572   :  { %8958 = vmatprep.subr.bf16.mxu0 %v11608_v32  ;;  %9006 = vmatprep.subr.bf16.mxu1 %v11609_v37  ;;  %v11618_v32 = vld [vmem:[#allocation16_spill] sm:$0xff]  ;;  %v7362_v37 = vadd.s32 4, %v7354_v25 }
 0x573   :  { %vm7359_vm0 = vcmp.ge.s32.totalorder %v11618_v32, %v7355_v10 }
 0x574   :  { %6454 = vmatmul.mubr.f32.vlgmr.msra.gmra.mrb[10].mxu0 %v10905_v3  ;;  %6997 = vmatmul.mubr.f32.vlgmr.msra.gmra.mrb[12].mxu1 %v10905_v3  ;;  %vm7366_vm12 = vcmp.lt.s32.totalorder %v11618_v32, %v7362_v37 }
 0x575   :  { %8960 = vmatpush1.bf16.msra.mxu0 %v11610_v11  ;;  %9008 = vmatpush1.bf16.msra.mxu1 %v11611_v50  ;;  %v9423_v11 = vmov 0.0|0.0   ;;  %v7363_v50 = vadd.s32 4, %v7355_v10 }
 0x576   :  { %8962 = vmatprep.subr.bf16.mxu0 %v11612_v9  ;;  %9010 = vmatprep.subr.bf16.mxu1 %v11613_v44  ;;  %v11619_v9 = vld [vmem:[#allocation18_spill] sm:$0xff] }
 0x577   :  { %6548 = vmatprep.mubr.f32.mxu0 %v11491_v58  ;;  %7091 = vmatprep.mubr.f32.mxu1 %v11491_v58  ;;  %v7356_v44 = vmul.u32 4, %v11619_v9  ;;  %vm7367_vm3 = vcmp.lt.s32.totalorder %v11618_v32, %v7363_v50 }
 0x579   :  { %8964 = vmatpush1.bf16.msra.mxu0 %v11614_v57  ;;  %9012 = vmatpush1.bf16.msra.mxu1 %v11615_v45  ;;  %v11620_v57 = vld [vmem:[#allocation19_spill] sm:$0xff]  ;;  %v7364_v59 = vadd.s32 4, %v7356_v44 }
 0x57a   :  { %8966 = vmatprep.subr.msk.bf16.mxu0 %vm9845_vm1, %v11476_v7  ;;  %9014 = vmatprep.subr.msk.bf16.mxu1 %vm10335_vm2, %v11476_v7  ;;  %vm7358_vm1 = vcmp.ge.s32.totalorder %v11618_v32, %v7354_v25  ;;  %v7357_v45 = vmul.u32 4, %v11620_v57  ;;  %vm7360_vm2 = vcmp.ge.s32.totalorder %v11618_v32, %v7356_v44 }
 0x57b   :  { %vm7368_vm13 = vcmp.lt.s32.totalorder %v11618_v32, %v7364_v59 }
 0x57c   :  { %6550 = vmatmul.mubr.f32.vlgmr.msra.gmra.mrb[10].mxu0 %v10899_v20  ;;  %7093 = vmatmul.mubr.f32.vlgmr.msra.gmra.mrb[12].mxu1 %v10899_v20  ;;  %v7365_v49 = vadd.s32 4, %v7357_v45  ;;  %vm7372_vm4 = vmand %vm7360_vm2, %vm7368_vm13 }
 0x57d   :  { %8968 = vmatpush1.bf16.msk.msra.mxu0 %vm9978_vm6, %v11476_v7  ;;  %9016 = vmatpush1.bf16.msk.msra.mxu1 %vm10372_vm8, %v11476_v7  ;;  %vm9424_vm6 = vmmov 0   ;;  %vm7371_vm8 = vmand %vm7359_vm0, %vm7367_vm3  ;;  %v8335_v43 = vsel %vm7372_vm4, 1.0, %v11491_v58 }
 0x57e   :  { %8970 = vmatprep.subr.msk.bf16.mxu0 %vm10092_vm5, %v11476_v7  ;;  %9018 = vmatprep.subr.msk.bf16.mxu1 %vm10408_vm11, %v11476_v7  ;;  %vm7370_vm5 = vmand %vm7358_vm1, %vm7366_vm12  ;;  %vm7361_vm11 = vcmp.ge.s32.totalorder %v11618_v32, %v7357_v45  ;;  %v8334_v26 = vsel %vm7371_vm8, 1.0, %v11491_v58  ;;  %vm7369_vm9 = vcmp.lt.s32.totalorder %v11618_v32, %v7365_v49  ;;  %vm7980_vm1 = vcmask 31744  }
 0x57f   :  { %6628 = vmatprep.mubr.f32.mxu0 %v11491_v58  ;;  %7171 = vmatprep.mubr.f32.mxu1 %v11491_v58  ;;  %v8333_v46 = vsel %vm7370_vm5, 1.0, %v11491_v58  ;;  %v11158_v47 = vsub.f32 %v8334_v26, %v8334_v26  ;;  %vm7373_vm14 = vmand %vm7361_vm11, %vm7369_vm9 }
 0x580   :  { %v11152_v2 = vsub.f32 %v8333_v46, %v8333_v46  ;;  %vm11165_vm15 = vmpackc.low %vm7373_vm14, %vm7372_vm4 }
 0x581   :  { %8972 = vmatpush1.bf16.msk.msra.mxu0 %vm11545_vm7, %v11476_v7  ;;  %9020 = vmatpush1.bf16.msk.msra.mxu1 %vm11591_vm10, %v11476_v7  ;;  %vm11148_vm7 = vmpackc.low %vm7371_vm8, %vm7370_vm5  ;;  %vm11625_vm10 = vcmask 261120  }
 0x582   :  { %9021 = vmatprep.subr.bf16.mxu0 %v9423_v11  ;;  %v9034_v36 = vpack.c.bf16 %v11158_v47, %v11152_v2 }
 0x584   :  { %6630 = vmatmul.mubr.f32.vlgmr.msra.gmra.mrb[10].mxu0 %v10899_v20  ;;  %7173 = vmatmul.mubr.f32.vlgmr.msra.gmra.mrb[12].mxu1 %v10899_v20  ;;  %v7262_v20 = vrot.slane %v9240_v19, %v10615_v23 }
 0x585   :  { %8387 = vmatprep.mubr.msk.f32.mxu0 %vm9424_vm6, %v11491_v58  ;;  %9023 = vmatpush3.bf16.msk.msra.mxu0 %vm11148_vm7, %v11476_v7 }
 0x586   :  { %v7265_v22 = vcombine.low %v7248_v63, %v7262_v20  ;;  %v7266_v21 = vcombine.high %v7248_v63, %v7262_v20  ;;  %9024 = vmatprep.subr.bf16.mxu0 %v9423_v11 }
 0x589   :  { %9026 = vmatpush3.bf16.msk.msra.mxu0 %vm11165_vm15, %v11476_v7 }
 0x58a   :  { %9027 = vmatprep.subr.bf16.mxu0 %v9423_v11 }
 0x627   :  { %v5545_v31 = vpop.f32.mrb[8].mxu0  ;;  %v6088_v1 = vpop.f32.mrb[10].mxu1 }
 0x628   :  { %v7275_v28 = vmul.f32 %v7227_v30, %v5545_v31  ;;  %v5547_v61 = vpop.f32.mrb[9].mxu0  ;;  %v6090_v0 = vpop.f32.mrb[11].mxu1  ;;  %v7277_v48 = vmul.f32 %v7229_v51, %v6088_v1  ;;  %v7487_v30 = vand.u32 4294901760, %v11152_v2  ;;  %v11169_v1 = vsub.f32 %v8335_v43, %v8335_v43 }
 0x629   :  { %v7276_v14 = vmul.f32 %v7228_v24, %v5547_v61  ;;  %v7278_v13 = vmul.f32 %v7230_v5, %v6090_v0  ;;  %v8336_v24 = vsel %vm7373_vm14, 1.0, %v11491_v58  ;;  %v7494_v51 = vand.u32 4294901760, %v11158_v47 }
 0x62a   :  { %v7488_v61 = vsub.f32 %v11152_v2, %v7487_v30  ;;  %v7501_v5 = vand.u32 4294901760, %v11169_v1  ;;  %v9291_v2 = vld.sshfl [vmem:[%s11279_s4] sm:$0xf pattern:$0x76325410] }
 0x62b   :  { %v7283_v53 = vadd.f32 %v7276_v14, %v7275_v28  ;;  %v11172_v28 = vsub.f32 %v8336_v24, %v8336_v24  ;;  %v7495_v0 = vsub.f32 %v11158_v47, %v7494_v51  ;;  %v11188_v19 = vpack.c.bf16 %v7494_v51, %v7487_v30  ;;  %v9292_v47 = vld.sshfl [vmem:[%s11279_s4 + $0x8] sm:$0xf pattern:$0x76325410] }
 0x62c   :  { %v7489_v14 = vand.u32 4294901760, %v7488_v61  ;;  %v7914_v41 = vcombine.low %v9291_v2, %v9292_v47 }
 0x62d   :  { %v7284_v38 = vadd.f32 %v7283_v53, %v7277_v48  ;;  %v7508_v48 = vand.u32 4294901760, %v11172_v28  ;;  %v7496_v53 = vand.u32 4294901760, %v7495_v0  ;;  %v9037_v55 = vpack.c.bf16 %v11172_v28, %v11169_v1 }
 0x62f   :  { %v7285_v27 = vadd.f32 %v7284_v38, %v7278_v13  ;;  %v7502_v13 = vsub.f32 %v11169_v1, %v7501_v5  ;;  %v7509_v38 = vsub.f32 %v11172_v28, %v7508_v48 }
 0x631   :  { %v7503_v35 = vand.u32 4294901760, %v7502_v13  ;;  %v7510_v6 = vand.u32 4294901760, %v7509_v38 }
 0x633   :  { %v9031_v8 = vpack.c.bf16 %v7510_v6, %v7503_v35 }
 0x657   :  { %v6631_v3 = vpop.f32.mrb[10].mxu0  ;;  %v7174_v12 = vpop.f32.mrb[12].mxu1 }
 0x658   :  { %v7279_v34 = vmul.f32 %v7263_v4, %v6631_v3  ;;  %v6633_v29 = vpop.f32.mrb[11].mxu0  ;;  %v7176_v40 = vpop.f32.mrb[13].mxu1  ;;  %v7281_v56 = vmul.f32 %v7265_v22, %v7174_v12  ;;  %v11190_v4 = vpack.c.bf16 %v7508_v48, %v7501_v5  ;;  %v4982_v22 = vld [vmem:[#allocation8 + $0x34] sm:$0x3] }
 0x659   :  { %v7280_v54 = vmul.f32 %v7264_v39, %v6633_v29  ;;  %v7282_v15 = vmul.f32 %v7266_v21, %v7176_v40  ;;  %v4980_v39 = vld [vmem:[#allocation8 + $0x10] sm:$0x3] }
 0x65a   :  { %v7286_v16 = vadd.f32 %v7285_v27, %v7279_v34  ;;  %v9028_v27 = vpack.c.bf16 %v7496_v53, %v7489_v14  ;;  %v4981_v34 = vld [vmem:[#allocation8 + $0x22] sm:$0x3] }
 0x65c   :  { %v7287_v62 = vadd.f32 %v7286_v16, %v7280_v54  ;;  %v4983_v16 = vld [vmem:[#allocation8 + $0x46] sm:$0x3] }
 0x65e   :  { %v7288_v18 = vadd.f32 %v7287_v62, %v7281_v56 }
 0x660   :  { %v7289_v42 = vadd.f32 %v7288_v18, %v7282_v15 }
 0x662   :  { %7290 = vrot.lane.b32.xlu0 %v7289_v42, %s9422_s3 }
 0x6d4   :  { %v7291_v60 = vpop.permute.xlu0 %7290 }
 0x6d5   :  { %v7292_v33 = vadd.f32 %v7291_v60, %v7289_v42 }
 0x6d7   :  { %7293 = vrot.lane.b32.xlu1 %v7292_v33, %s9412_s29 }
 0x749   :  { %v7294_v63 = vpop.permute.xlu1 %7293 }
 0x74a   :  { %v7295_v20 = vadd.f32 %v7294_v63, %v7292_v33 }
 0x74c   :  { %v7297_v3 = vcombine.high %v7295_v20, %v7295_v20  ;;  %v7304_v12 = vrot.slane %v7295_v20, %v10615_v23  ;;  %v7350_v20 = vld [vmem:[%s11279_s4 + $0x2] sm:$0x3] }
 0x74e   :  { %v7311_v29 = vrot.slane %v7297_v3, %v10615_v23  ;;  %v7312_v40 = vcombine.high %v7304_v12, %v7304_v12  ;;  %v7318_v54 = vadd.f32 %v7304_v12, %v4980_v39  ;;  %v7351_v39 = vld [vmem:[%s11279_s4 + $0x6] sm:$0x3] }
 0x750   :  { %v7313_v21 = vcombine.high %v7311_v29, %v7311_v29  ;;  %v7319_v56 = vadd.f32 %v7312_v40, %v4981_v34  ;;  %v7320_v62 = vadd.f32 %v7311_v29, %v4982_v22  ;;  %v8329_v15 = vmul.f32 -1.442695, %v7318_v54  ;;  %v7352_v34 = vld [vmem:[%s11279_s4 + $0xa] sm:$0x3]  ;;  %v7353_v22 = vld [vmem:[%s11279_s4 + $0xe] sm:$0x3] }
 0x752   :  { %v7321_v18 = vadd.f32 %v7313_v21, %v4983_v16  ;;  %9275 = vpow2.f32 %v8329_v15  ;;  %v8330_v42 = vmul.f32 -1.442695, %v7319_v56  ;;  %v8331_v60 = vmul.f32 -1.442695, %v7320_v62 }
 0x754   :  { %9277 = vpow2.f32 %v8330_v42  ;;  %v8332_v33 = vmul.f32 -1.442695, %v7321_v18 }
 0x755   :  { %9279 = vpow2.f32 %v8331_v60 }
 0x756   :  { %9281 = vpow2.f32 %v8332_v33 }
 0x75c   :  { %v9276_v52 = vpop.eup %9275 }
 0x75d   :  { %v7334_v25 = vadd.f32 1.0, %v9276_v52 }
 0x75e   :  { %v9278_v17 = vpop.eup %9277 }
 0x75f   :  { %v9280_v10 = vpop.eup %9279  ;;  %v7335_v32 = vadd.f32 1.0, %v9278_v17  ;;  %9283 = vrcp.f32 %v7334_v25 }
 0x760   :  { %v9282_v37 = vpop.eup %9281  ;;  %v7336_v50 = vadd.f32 1.0, %v9280_v10 }
 0x761   :  { %v7337_v9 = vadd.f32 1.0, %v9282_v37  ;;  %9285 = vrcp.f32 %v7335_v32 }
 0x762   :  { %9287 = vrcp.f32 %v7336_v50 }
 0x763   :  { %9289 = vrcp.f32 %v7337_v9 }
 0x769   :  { %v9284_v44 = vpop.eup %9283 }
 0x76a   :  { %v7346_v59 = vmul.f32 %v9284_v44, %v7318_v54 }
 0x76b   :  { %v9286_v57 = vpop.eup %9285 }
 0x76c   :  { %v9288_v45 = vpop.eup %9287  ;;  %v7347_v46 = vmul.f32 %v9286_v57, %v7319_v56 }
 0x76d   :  { %v9290_v49 = vpop.eup %9289  ;;  %v7348_v26 = vmul.f32 %v9288_v45, %v7320_v62 }
 0x76e   :  { %v7349_v43 = vmul.f32 %v9290_v49, %v7321_v18  ;;  %v7386_v30 = vcombine.low %v7346_v59, %v7347_v46 }
 0x770   :  { %v7387_v24 = vcombine.low %v7348_v26, %v7349_v43  ;;  %v7394_v51 = vrot.slane %v7386_v30, %v10615_v23 }
 0x772   :  { %v7401_v61 = vrot.slane %v7387_v24, %v10615_v23 }
 0x774   :  { %v7402_v0 = vcombine.low %v7394_v51, %v7401_v61 }
 0x776   :  { %v7403_v14 = vsel %vm11625_vm10, %v7402_v0, 0 }
 0x777   :  { %v7474_v5 = vand.u32 4294901760, %v7403_v14 }
 0x779   :  { %v7475_v48 = vsub.f32 %v7403_v14, %v7474_v5 }
 0x77b   :  { %v7476_v53 = vand.u32 4294901760, %v7475_v48 }
 0x77d   :  { %v7477_v13 = vsub.f32 %v7475_v48, %v7476_v53 }
 0x77f   :  { %v7478_v38 = vand.u32 4294901760, %v7477_v13 }
 0x781   :  { %8388 = vmatmul.mubr.f32.vlgmr.msra.gmra.mrb[12].mxu0 %v7478_v38 }
 0x782   :  { %9029 = vmatpush3.bf16.msra.mxu0 %v9028_v27  ;;  %8398 = vmatprep.mubr.msk.f32.mxu0 %vm9424_vm6, %v11491_v58 }
 0x783   :  { %9030 = vmatprep.subr.bf16.mxu0 %v9423_v11 }
 0x786   :  { %9032 = vmatpush3.bf16.msra.mxu0 %v9031_v8 }
 0x787   :  { %9033 = vmatprep.subr.bf16.mxu0 %v9423_v11 }
 0x789   :  { %8399 = vmatmul.mubr.f32.vlgmr.msra.gmra.mrb[12].mxu0 %v7474_v5 }
 0x78a   :  { %9035 = vmatpush3.bf16.msra.mxu0 %v9034_v36  ;;  %8409 = vmatprep.mubr.msk.f32.mxu0 %vm9424_vm6, %v11491_v58 }
 0x78b   :  { %9036 = vmatprep.subr.bf16.mxu0 %v9423_v11 }
 0x78e   :  { %9038 = vmatpush3.bf16.msra.mxu0 %v9037_v55 }
 0x78f   :  { %9039 = vmatprep.subr.bf16.mxu0 %v9423_v11 }
 0x791   :  { %8410 = vmatmul.mubr.f32.vlgmr.msra.gmra.mrb[12].mxu0 %v7475_v48 }
 0x792   :  { %9041 = vmatpush3.bf16.msk.msra.mxu0 %vm11148_vm7, %v11476_v7  ;;  %8420 = vmatprep.mubr.msk.f32.mxu0 %vm9424_vm6, %v11491_v58 }
 0x793   :  { %9042 = vmatprep.subr.bf16.mxu0 %v9423_v11 }
 0x796   :  { %9044 = vmatpush3.bf16.msk.msra.mxu0 %vm11165_vm15, %v11476_v7 }
 0x797   :  { %9045 = vmatprep.subr.bf16.mxu0 %v9423_v11 }
 0x799   :  { %8421 = vmatmul.mubr.f32.vlgmr.msra.gmra.mrb[12].mxu0 %v7476_v53 }
 0x79a   :  { %9047 = vmatpush3.bf16.msra.mxu0 %v11188_v19  ;;  %8431 = vmatprep.mubr.msk.f32.mxu0 %vm9424_vm6, %v11491_v58 }
 0x79b   :  { %9048 = vmatprep.subr.bf16.mxu0 %v9423_v11 }
 0x79e   :  { %9050 = vmatpush3.bf16.msra.mxu0 %v11190_v4 }
 0x79f   :  { %9051 = vmatprep.subr.bf16.mxu0 %v9423_v11 }
 0x7a1   :  { %8432 = vmatmul.mubr.f32.vlgmr.msra.gmra.mrb[12].mxu0 %v7474_v5 }
 0x7a2   :  { %9053 = vmatpush3.bf16.msk.msra.mxu0 %vm11148_vm7, %v11476_v7  ;;  %8442 = vmatprep.mubr.msk.f32.mxu0 %vm9424_vm6, %v11491_v58 }
 0x7a3   :  { %9054 = vmatprep.subr.bf16.mxu0 %v9423_v11 }
 0x7a6   :  { %9056 = vmatpush3.bf16.msk.msra.mxu0 %vm11165_vm15, %v11476_v7 }
 0x7a9   :  { %8443 = vmatmul.mubr.f32.vlgmr.msra.gmra.mrb[12].mxu0 %v7474_v5 }
 0x87c   :  { %v7886_v1 = vpop.f32.mrb[12].mxu0 }
 0x87d   :  { %v7916_v28 = vmul.f32 %v7914_v41, %v7886_v1  ;;  %v8444_v27 = vpop.f32.mrb[13].mxu0 }
 0x87f   :  { %7917 = vrot.lane.b32.xlu0 %v7916_v28, %s9422_s3 }
 0x8f1   :  { %v7918_v58 = vpop.permute.xlu0 %7917 }
 0x8f2   :  { %v7919_v11 = vadd.f32 %v7918_v58, %v7916_v28 }
 0x8f4   :  { %7920 = vrot.lane.b32.xlu1 %v7919_v11, %s9412_s29 }
 0x966   :  { %v7921_v7 = vpop.permute.xlu1 %7920 }
 0x967   :  { %v7922_v31 = vadd.f32 %v7921_v7, %v7919_v11 }
 0x969   :  { %7923 = vrot.lane.b32.xlu0 %v7922_v31, %s9425_s26 }
 0x9db   :  { %v7924_v35 = vpop.permute.xlu0 %7923 }
 0x9dc   :  { %v7925_v6 = vadd.f32 %v7924_v35, %v7922_v31 }
 0x9de   :  { %7926 = vrot.lane.b32.xlu1 %v7925_v6, %s9426_s27 }
 0xa50   :  { %v7927_v8 = vpop.permute.xlu1 %7926 }
 0xa51   :  { %v7928_v36 = vadd.f32 %v7927_v8, %v7925_v6 }
 0xa53   :  { %7929 = vrot.lane.b32.xlu0 %v7928_v36, %s9427_s28 }
 0xac5   :  { %v7930_v55 = vpop.permute.xlu0 %7929 }
 0xac6   :  { %v7931_v19 = vadd.f32 %v7930_v55, %v7928_v36 }
 0xac8   :  { %v7933_v4 = vcombine.high %v7931_v19, %v7931_v19  ;;  %v7940_v63 = vrot.slane %v7931_v19, %v10615_v23 }
 0xaca   :  { %v7947_v3 = vrot.slane %v7933_v4, %v10615_v23  ;;  %v7948_v12 = vcombine.high %v7940_v63, %v7940_v63  ;;  %v7954_v40 = vadd.f32 %v7940_v63, %v7350_v20 }
 0xacc   :  { %v7949_v29 = vcombine.high %v7947_v3, %v7947_v3  ;;  %v7955_v54 = vadd.f32 %v7948_v12, %v7351_v39  ;;  %v7956_v16 = vadd.f32 %v7947_v3, %v7352_v34 }
 0xace   :  { %v7957_v21 = vadd.f32 %v7949_v29, %v7353_v22  ;;  %v7962_v56 = vcombine.low %v7954_v40, %v7955_v54 }
 0xad0   :  { %v7963_v62 = vcombine.low %v7956_v16, %v7957_v21  ;;  %v7970_v15 = vrot.slane %v7962_v56, %v10615_v23 }
 0xad2   :  { %v7977_v18 = vrot.slane %v7963_v62, %v10615_v23 }
 0xad4   :  { %v7978_v42 = vcombine.low %v7970_v15, %v7977_v18 }
 0xad6   :  { %7981 = vst.msk [vmem:[#allocation10] sm:$0xff] %vm7980_vm1, %v7978_v42 }
 0xad7   :  { %7986 = vsyncadd [#allocation4], 96  ;;  %s9428_s13 = smov [#allocation10]  }
 0xad8   :  { %s7987_s14 = sshll.u32 %s9428_s13, 4  ;;  %s7988_s14 = int_to_ptr.vmem [resolvable:$true] %s7987_s14 }
 0xad9   :  { %s9381_s15 = scalar_lea.vmem %s7988_s14, 32  ;;  %s9385_s4 = scalar_lea.vmem %s7988_s14, 128 }
 0xada   :  { %p9382_p4 = scmp.ne.s32.totalorder %s7988_s14, %s9381_s15  ;;  %p9386_p5 = scmp.lt.s32.totalorder %s7988_s14, %s7988_s14 }
 0xadb   :  { %p9387_p6 = scmp.lt.s32.totalorder %s9385_s4, %s9381_s15 }
 0xadd   :  { %p9388_p7 = por %p9387_p6, %p9386_p5 }
 0xadf   :  { %p9389_p8 = pnand %p9388_p7, %p9382_p4 }
 0xae1   :  { %9392 = shalt.err (!%p9389_p8)
}
 0xae2   :  { %s9393_s0 = scalar_lea.hbm %s11280_s5, 32 }
 0xae3   :  { %p9394_p9 = scmp.ne.s32.totalorder %s11280_s5, %s9393_s0  ;;  %p9397_p10 = scmp.lt.u32.totalorder %s9393_s0, %s11280_s5 }
 0xae5   :  { %p9399_p11 = pnand %p9397_p10, %p9394_p9 }
 0xae7   :  { %9402 = shalt.err (!%p9399_p11)
}
 0xae8   :  { %7993 = dma.vmem_to_hbm [thread:$0]  %s7988_s14, 32, %s11280_s5, [#allocation4], %s9412_s29, %s9412_s29, %s9413_s30  }
 0xae9   :  { %9409 = dma.done.wait [#allocation4], 128  }
 0xaea   :  { %9410 = vsyncadd [#allocation4], 4294967168 }
 0xaeb   :  { %7997 = vsyncpa [#allocation3], 1 }
 0xaec   :  { %7998 = vsyncpa [#allocation6], 1 }
 0xaed   :  { %7999 = vsyncpa [#allocation9], 1 }
 0xaee   :  { %8000 = vsyncpa [#allocation4], 1 }

</bundles_post_ra>
